<compile_context>
chip_gen: v5e
topology: v5e:2x2
jax: 0.10.0
libtpu: 0.0.40
codegen_flags: <defaults>
</compile_context>

<pallas_src>
import functools

import jax
import jax.numpy as jnp
import numpy as np
from jax import lax
from jax.experimental import pallas as pl
from jax.experimental.pallas import tpu as pltpu


def _round_up(x, m):
    return (x + m - 1) // m * m


def _pad_gate_rows(w, h, hp):
    """Pad a PyTorch-style (4*h, ...) gate-stacked tensor to (4*hp, ...),
    padding each of the 4 gate blocks (i, f, g, o) independently with zeros."""
    w4 = w.reshape(4, h, *w.shape[1:])
    pad_cfg = ((0, 0), (0, hp - h)) + ((0, 0),) * (w.ndim - 1)
    w4 = jnp.pad(w4, pad_cfg)
    return w4.reshape(4 * hp, *w.shape[1:])


def lstm_rnn_kernel(x_ref, wih_ref, whh_ref, b_ref, wout_ref, bout_ref,
                    out_ref, zx_ref, h_ref, c_ref, *, seq_len):
    # x_ref:    (Tc, Bp, Ip)    time-major chunk of the padded input (bf16)
    # wih_ref:  (Ip, 4*Hp)      input->hidden weights   (bf16)
    # whh_ref:  (Hp, 4*Hp)      hidden->hidden weights  (bf16)
    # b_ref:    (1, 4*Hp)       bias_ih + bias_hh       (fp32)
    # wout_ref: (Hp, Op)        output Linear weight    (bf16)
    # bout_ref: (1, Op)         output Linear bias      (fp32)
    # out_ref:  (Bp, Op)        prediction, written at the last time chunk
    # zx_ref:   (Tc, Bp, 4*Hp)  fp32 scratch: hoisted input projection
    # h_ref/c_ref: (Bp, Hp)     fp32 recurrent state carried across chunks
    chunk = pl.program_id(0)
    nchunks = pl.num_programs(0)
    Tc, Bp, Ip = x_ref.shape
    Hp = whh_ref.shape[0]
    G = 4 * Hp

    @pl.when(chunk == 0)
    def _init():
        h_ref[...] = jnp.zeros_like(h_ref)
        c_ref[...] = jnp.zeros_like(c_ref)

    # --- Hoisted input projection: one big bf16 MXU matmul per chunk. -------
    xc = x_ref[...].reshape(Tc * Bp, Ip)                       # already bf16
    zx = jnp.dot(xc, wih_ref[...], preferred_element_type=jnp.float32)
    zx_ref[...] = (zx + b_ref[...]).reshape(Tc, Bp, G)

    whh = whh_ref[...]                 # (Hp, 4Hp) bf16, resident across steps
    t0 = chunk * Tc
    needs_mask = (seq_len % Tc) != 0   # static: only when T was padded in time

    def step(k, carry):
        h, c = carry
        z = zx_ref[k] + jnp.dot(h.astype(jnp.bfloat16), whh,
                                preferred_element_type=jnp.float32)
        # Lane-aligned gate slices (each exactly Hp = multiple of 128 lanes),
        # PyTorch gate order (i, f, g, o); activations stay fp32 (EUP path).
        i_g = jax.nn.sigmoid(z[:, 0 * Hp:1 * Hp])
        f_g = jax.nn.sigmoid(z[:, 1 * Hp:2 * Hp])
        g_g = jnp.tanh(z[:, 2 * Hp:3 * Hp])
        o_g = jax.nn.sigmoid(z[:, 3 * Hp:4 * Hp])
        c_new = f_g * c + i_g * g_g
        h_new = o_g * jnp.tanh(c_new)
        if needs_mask:
            valid = (t0 + k) < seq_len
            h_new = jnp.where(valid, h_new, h)
            c_new = jnp.where(valid, c_new, c)
        return h_new, c_new

    h, c = lax.fori_loop(0, Tc, step, (h_ref[...], c_ref[...]), unroll=True)
    h_ref[...] = h
    c_ref[...] = c

    @pl.when(chunk == nchunks - 1)
    def _finalize():
        out_ref[...] = (jnp.dot(h.astype(jnp.bfloat16), wout_ref[...],
                                preferred_element_type=jnp.float32)
                        + bout_ref[...])


def lstm_rnn_forward(x, params, *, time_chunk=16):
    """x: (B, T, I) batch-first fp32, params in raw PyTorch layout.
    Returns the (B, O) prediction = Linear(lstm_out[:, -1, :])."""
    w_ih, w_hh, b_ih, b_hh, w_out, b_out = params
    B, T, I = x.shape
    H = w_hh.shape[1]
    O = w_out.shape[0]

    Bp = _round_up(B, 8)        # sublane multiple
    Ip = _round_up(I, 128)      # lane multiples
    Hp = _round_up(H, 128)
    Op = _round_up(O, 128)
    G = 4 * Hp

    # --- weights: pad per-gate, transpose for right-multiplication, bf16 ----
    wih = _pad_gate_rows(w_ih, H, Hp)                       # (4Hp, I)
    wih = jnp.pad(wih, ((0, 0), (0, Ip - I))).T             # (Ip, 4Hp)
    wih = wih.astype(jnp.bfloat16)

    whh = _pad_gate_rows(w_hh, H, Hp)                       # (4Hp, H)
    whh = jnp.pad(whh, ((0, 0), (0, Hp - H))).T             # (Hp, 4Hp)
    whh = whh.astype(jnp.bfloat16)

    b = _pad_gate_rows(b_ih + b_hh, H, Hp)[None, :].astype(jnp.float32)

    wout = jnp.pad(w_out, ((0, Op - O), (0, Hp - H))).T.astype(jnp.bfloat16)
    bout = jnp.pad(b_out, (0, Op - O))[None, :].astype(jnp.float32)

    # --- input: fused pad + batch-first -> time-major, stored bf16 ----------
    # (the kernel only uses x inside a bf16 MXU matmul, so pre-casting halves
    #  the per-chunk HBM->VMEM DMA with no change in numerics)
    tc = max(1, min(time_chunk, T))
    Tp = _round_up(T, tc)
    nchunks = Tp // tc
    x_tm = jnp.transpose(x.astype(jnp.bfloat16), (1, 0, 2))       # (T, B, I)
    x_tm = jnp.pad(x_tm, ((0, Tp - T), (0, Bp - B), (0, Ip - I)))  # (Tp,Bp,Ip)

    # VMEM budget: 2x-buffered bf16 x chunk + weights + biases + scratch + out.
    vmem_bytes = (2 * tc * Bp * Ip * 2
                  + (Ip + Hp) * G * 2 + Hp * Op * 2 + (G + Op) * 4
                  + tc * Bp * G * 4 + 2 * Bp * Hp * 4 + Bp * Op * 4)
    vmem_limit = max(32 * 1024 * 1024, 2 * vmem_bytes)

    kernel = functools.partial(lstm_rnn_kernel, seq_len=T)

    out = pl.pallas_call(
        kernel,
        out_shape=jax.ShapeDtypeStruct((Bp, Op), jnp.float32),
        grid_spec=pltpu.PrefetchScalarGridSpec(
            num_scalar_prefetch=0,
            grid=(nchunks,),
            in_specs=[
                pl.BlockSpec((tc, Bp, Ip), lambda t: (t, 0, 0)),  # x chunk
                pl.BlockSpec((Ip, G), lambda t: (0, 0)),          # W_ih
                pl.BlockSpec((Hp, G), lambda t: (0, 0)),          # W_hh
                pl.BlockSpec((1, G), lambda t: (0, 0)),           # bias
                pl.BlockSpec((Hp, Op), lambda t: (0, 0)),         # W_out
                pl.BlockSpec((1, Op), lambda t: (0, 0)),          # b_out
            ],
            out_specs=pl.BlockSpec((Bp, Op), lambda t: (0, 0)),
            scratch_shapes=[
                pltpu.VMEM((tc, Bp, G), jnp.float32),  # hoisted Zx chunk
                pltpu.VMEM((Bp, Hp), jnp.float32),     # h carry
                pltpu.VMEM((Bp, Hp), jnp.float32),     # c carry
            ],
        ),
        compiler_params=pltpu.CompilerParams(
            dimension_semantics=("arbitrary",),   # recurrence over time chunks
            vmem_limit_bytes=int(vmem_limit),
        ),
    )(x_tm, wih, whh, b, wout, bout)

    return out[:B, :O]


def init_params(key, input_size, hidden_size, output_size):
    """Deterministic synthetic parameters with nn.LSTM / nn.Linear layouts."""
    k = jax.random.split(key, 6)
    s = 1.0 / np.sqrt(hidden_size)

    def u(kk, shape):
        return jax.random.uniform(kk, shape, jnp.float32, -s, s)

    w_ih = u(k[0], (4 * hidden_size, input_size))
    w_hh = u(k[1], (4 * hidden_size, hidden_size))
    b_ih = u(k[2], (4 * hidden_size,))
    b_hh = u(k[3], (4 * hidden_size,))
    w_out = u(k[4], (output_size, hidden_size))
    b_out = u(k[5], (output_size,))
    return (w_ih, w_hh, b_ih, b_hh, w_out, b_out)


def lstm_rnn_reference(x, params):
    """Pure-JAX fp32 reference replicating nn.LSTM + Linear forward."""
    w_ih, w_hh, b_ih, b_hh, w_out, b_out = params
    B, T, _ = x.shape
    H = w_hh.shape[1]
    h = jnp.zeros((B, H), jnp.float32)
    c = jnp.zeros((B, H), jnp.float32)
    for t in range(T):
        z = x[:, t, :] @ w_ih.T + h @ w_hh.T + b_ih + b_hh
        i_g = jax.nn.sigmoid(z[:, 0:H])
        f_g = jax.nn.sigmoid(z[:, H:2 * H])
        g_g = jnp.tanh(z[:, 2 * H:3 * H])
        o_g = jax.nn.sigmoid(z[:, 3 * H:4 * H])
        c = f_g * c + i_g * g_g
        h = o_g * jnp.tanh(c)
    return h @ w_out.T + b_out


if __name__ == "__main__":
    # Lorenz-system-style sizes: 3 input features, 3 output features.
    batch, seq, input_size, hidden_size, output_size = 2, 8, 3, 32, 3

    key = jax.random.PRNGKey(0)
    kx, kp = jax.random.split(key)
    x = jax.random.normal(kx, (batch, seq, input_size), jnp.float32)
    params = init_params(kp, input_size, hidden_size, output_size)

    pred = jax.jit(lstm_rnn_forward)(x, params)
    pred = jax.block_until_ready(pred)

    ref = lstm_rnn_reference(x, params)
    # bf16 MXU matmuls (fp32 accumulation) -> loosened tolerance vs fp32 ref.
    np.testing.assert_allclose(np.asarray(pred), np.asarray(ref),
                               rtol=2e-2, atol=2e-2)
    print("KERNEL_OK")
</pallas_src>

<mosaic_0001>
module attributes {stable_mosaic.version = 11 : i64} {
  func.func @lstm_rnn_kernel(%arg0: i32, %arg1: memref<8x8x128xbf16, #tpu.memory_space<vmem>>, %arg2: memref<128x512xbf16, #tpu.memory_space<vmem>>, %arg3: memref<128x512xbf16, #tpu.memory_space<vmem>>, %arg4: memref<1x512xf32, #tpu.memory_space<vmem>>, %arg5: memref<128x128xbf16, #tpu.memory_space<vmem>>, %arg6: memref<1x128xf32, #tpu.memory_space<vmem>>, %arg7: memref<8x128xf32, #tpu.memory_space<vmem>>, %arg8: memref<8x8x512xf32, #tpu.memory_space<vmem>>, %arg9: memref<8x128xf32, #tpu.memory_space<vmem>>, %arg10: memref<8x128xf32, #tpu.memory_space<vmem>>) attributes {dimension_semantics = [#tpu.dimension_semantics<arbitrary>], iteration_bounds = array<i64: 1>, scalar_prefetch = 0 : i64, scratch_operands = 3 : i64, tpu.core_type = #tpu.core_type<tc>, window_params = [{transform_indices = @transform_0, window_bounds = array<i64: 8, 8, 128>}, {pipeline_mode = #tpu.pipeline_mode<synchronous>, transform_indices = @transform_1, window_bounds = array<i64: 128, 512>}, {pipeline_mode = #tpu.pipeline_mode<synchronous>, transform_indices = @transform_2, window_bounds = array<i64: 128, 512>}, {pipeline_mode = #tpu.pipeline_mode<synchronous>, transform_indices = @transform_3, window_bounds = array<i64: 1, 512>}, {pipeline_mode = #tpu.pipeline_mode<synchronous>, transform_indices = @transform_4, window_bounds = array<i64: 128, 128>}, {pipeline_mode = #tpu.pipeline_mode<synchronous>, transform_indices = @transform_5, window_bounds = array<i64: 1, 128>}, {pipeline_mode = #tpu.pipeline_mode<synchronous>, transform_indices = @transform_6, window_bounds = array<i64: 8, 128>}]} {
    %c0_i32 = arith.constant 0 : i32
    %0 = arith.cmpi eq, %arg0, %c0_i32 : i32
    %1 = arith.extui %0 : i1 to i32
    %c0_i32_0 = arith.constant 0 : i32
    %2 = arith.cmpi ne, %1, %c0_i32_0 : i32
    scf.if %2 {
      %cst_71 = arith.constant 0.000000e+00 : f32
      %268 = vector.broadcast %cst_71 : f32 to vector<8x128xf32>
      %c0_72 = arith.constant 0 : index
      %c0_73 = arith.constant 0 : index
      %269 = vector.load %arg9[%c0_72, %c0_73] : memref<8x128xf32, #tpu.memory_space<vmem>>, vector<8x128xf32>
      tpu.vector_store %arg9[%c0_72, %c0_73], %268 {strides = array<i32>} : memref<8x128xf32, #tpu.memory_space<vmem>>, vector<8x128xf32>,
      %cst_74 = arith.constant 0.000000e+00 : f32
      %270 = vector.broadcast %cst_74 : f32 to vector<8x128xf32>
      %c0_75 = arith.constant 0 : index
      %c0_76 = arith.constant 0 : index
      %271 = vector.load %arg10[%c0_75, %c0_76] : memref<8x128xf32, #tpu.memory_space<vmem>>, vector<8x128xf32>
      tpu.vector_store %arg10[%c0_75, %c0_76], %270 {strides = array<i32>} : memref<8x128xf32, #tpu.memory_space<vmem>>, vector<8x128xf32>,
    } else {
    }
    %c0 = arith.constant 0 : index
    %c0_1 = arith.constant 0 : index
    %c0_2 = arith.constant 0 : index
    %3 = vector.load %arg1[%c0, %c0_1, %c0_2] : memref<8x8x128xbf16, #tpu.memory_space<vmem>>, vector<8x8x128xbf16>
    %4 = vector.shape_cast %3 : vector<8x8x128xbf16> to vector<64x128xbf16>
    %c0_3 = arith.constant 0 : index
    %c0_4 = arith.constant 0 : index
    %5 = vector.load %arg2[%c0_3, %c0_4] : memref<128x512xbf16, #tpu.memory_space<vmem>>, vector<128x512xbf16>
    %cst = arith.constant dense<0.000000e+00> : vector<64x512xf32>
    %6 = tpu.matmul %4, %5, %cst {dimension_numbers = #tpu.dot_dimension_numbers<[1], [0], [0], [1], [0, 0, 1, 1], [], []>} : vector<64x128xbf16>, vector<128x512xbf16>, vector<64x512xf32> -> vector<64x512xf32>
    %c0_5 = arith.constant 0 : index
    %c0_6 = arith.constant 0 : index
    %7 = vector.load %arg4[%c0_5, %c0_6] : memref<1x512xf32, #tpu.memory_space<vmem>>, vector<1x512xf32>
    %8 = vector.broadcast %7 : vector<1x512xf32> to vector<64x512xf32>
    %9 = arith.addf %6, %8 : vector<64x512xf32>
    %10 = vector.shape_cast %9 : vector<64x512xf32> to vector<8x8x512xf32>
    %c0_7 = arith.constant 0 : index
    %c0_8 = arith.constant 0 : index
    %c0_9 = arith.constant 0 : index
    %11 = vector.load %arg8[%c0_7, %c0_8, %c0_9] : memref<8x8x512xf32, #tpu.memory_space<vmem>>, vector<8x8x512xf32>
    tpu.vector_store %arg8[%c0_7, %c0_8, %c0_9], %10 {strides = array<i32>} : memref<8x8x512xf32, #tpu.memory_space<vmem>>, vector<8x8x512xf32>,
    %c0_10 = arith.constant 0 : index
    %c0_11 = arith.constant 0 : index
    %12 = vector.load %arg3[%c0_10, %c0_11] : memref<128x512xbf16, #tpu.memory_space<vmem>>, vector<128x512xbf16>
    %c0_12 = arith.constant 0 : index
    %c0_13 = arith.constant 0 : index
    %13 = vector.load %arg9[%c0_12, %c0_13] : memref<8x128xf32, #tpu.memory_space<vmem>>, vector<8x128xf32>
    %c0_14 = arith.constant 0 : index
    %c0_15 = arith.constant 0 : index
    %14 = vector.load %arg10[%c0_14, %c0_15] : memref<8x128xf32, #tpu.memory_space<vmem>>, vector<8x128xf32>
    %c0_i32_16 = arith.constant 0 : i32
    %15 = arith.index_cast %c0_i32_16 : i32 to index
    %c0_17 = arith.constant 0 : index
    %c0_18 = arith.constant 0 : index
    %16 = vector.load %arg8[%15, %c0_17, %c0_18] : memref<8x8x512xf32, #tpu.memory_space<vmem>>, vector<1x8x512xf32>
    %17 = vector.shape_cast %16 : vector<1x8x512xf32> to vector<8x512xf32>
    %18 = arith.truncf %13 : vector<8x128xf32> to vector<8x128xbf16>
    %cst_19 = arith.constant dense<0.000000e+00> : vector<8x512xf32>
    %19 = tpu.matmul %18, %12, %cst_19 {dimension_numbers = #tpu.dot_dimension_numbers<[1], [0], [0], [1], [0, 0, 1, 1], [], []>} : vector<8x128xbf16>, vector<128x512xbf16>, vector<8x512xf32> -> vector<8x512xf32>
    %20 = arith.addf %17, %19 : vector<8x512xf32>
    %21 = vector.extract_strided_slice %20 {offsets = [0, 0], sizes = [8, 128], strides = [1, 1]} : vector<8x512xf32> to vector<8x128xf32>
    %22 = arith.negf %21 : vector<8x128xf32>
    %23 = math.exp %22 : vector<8x128xf32>
    %cst_20 = arith.constant 1.000000e+00 : f32
    %24 = vector.broadcast %cst_20 : f32 to vector<8x128xf32>
    %25 = arith.addf %24, %23 : vector<8x128xf32>
    %26 = arith.divf %24, %25 : vector<8x128xf32>
    %27 = vector.extract_strided_slice %20 {offsets = [0, 128], sizes = [8, 128], strides = [1, 1]} : vector<8x512xf32> to vector<8x128xf32>
    %28 = arith.negf %27 : vector<8x128xf32>
    %29 = math.exp %28 : vector<8x128xf32>
    %cst_21 = arith.constant 1.000000e+00 : f32
    %30 = vector.broadcast %cst_21 : f32 to vector<8x128xf32>
    %31 = arith.addf %30, %29 : vector<8x128xf32>
    %32 = arith.divf %30, %31 : vector<8x128xf32>
    %33 = vector.extract_strided_slice %20 {offsets = [0, 256], sizes = [8, 128], strides = [1, 1]} : vector<8x512xf32> to vector<8x128xf32>
    %34 = math.tanh %33 : vector<8x128xf32>
    %35 = vector.extract_strided_slice %20 {offsets = [0, 384], sizes = [8, 128], strides = [1, 1]} : vector<8x512xf32> to vector<8x128xf32>
    %36 = arith.negf %35 : vector<8x128xf32>
    %37 = math.exp %36 : vector<8x128xf32>
    %cst_22 = arith.constant 1.000000e+00 : f32
    %38 = vector.broadcast %cst_22 : f32 to vector<8x128xf32>
    %39 = arith.addf %38, %37 : vector<8x128xf32>
    %40 = arith.divf %38, %39 : vector<8x128xf32>
    %41 = arith.mulf %32, %14 : vector<8x128xf32>
    %42 = arith.mulf %26, %34 : vector<8x128xf32>
    %43 = arith.addf %41, %42 : vector<8x128xf32>
    %44 = math.tanh %43 : vector<8x128xf32>
    %45 = arith.mulf %40, %44 : vector<8x128xf32>
    %c1_i32 = arith.constant 1 : i32
    %46 = arith.index_cast %c1_i32 : i32 to index
    %c0_23 = arith.constant 0 : index
    %c0_24 = arith.constant 0 : index
    %47 = vector.load %arg8[%46, %c0_23, %c0_24] : memref<8x8x512xf32, #tpu.memory_space<vmem>>, vector<1x8x512xf32>
    %48 = vector.shape_cast %47 : vector<1x8x512xf32> to vector<8x512xf32>
    %49 = arith.truncf %45 : vector<8x128xf32> to vector<8x128xbf16>
    %cst_25 = arith.constant dense<0.000000e+00> : vector<8x512xf32>
    %50 = tpu.matmul %49, %12, %cst_25 {dimension_numbers = #tpu.dot_dimension_numbers<[1], [0], [0], [1], [0, 0, 1, 1], [], []>} : vector<8x128xbf16>, vector<128x512xbf16>, vector<8x512xf32> -> vector<8x512xf32>
    %51 = arith.addf %48, %50 : vector<8x512xf32>
    %52 = vector.extract_strided_slice %51 {offsets = [0, 0], sizes = [8, 128], strides = [1, 1]} : vector<8x512xf32> to vector<8x128xf32>
    %53 = arith.negf %52 : vector<8x128xf32>
    %54 = math.exp %53 : vector<8x128xf32>
    %cst_26 = arith.constant 1.000000e+00 : f32
    %55 = vector.broadcast %cst_26 : f32 to vector<8x128xf32>
    %56 = arith.addf %55, %54 : vector<8x128xf32>
    %57 = arith.divf %55, %56 : vector<8x128xf32>
    %58 = vector.extract_strided_slice %51 {offsets = [0, 128], sizes = [8, 128], strides = [1, 1]} : vector<8x512xf32> to vector<8x128xf32>
    %59 = arith.negf %58 : vector<8x128xf32>
    %60 = math.exp %59 : vector<8x128xf32>
    %cst_27 = arith.constant 1.000000e+00 : f32
    %61 = vector.broadcast %cst_27 : f32 to vector<8x128xf32>
    %62 = arith.addf %61, %60 : vector<8x128xf32>
    %63 = arith.divf %61, %62 : vector<8x128xf32>
    %64 = vector.extract_strided_slice %51 {offsets = [0, 256], sizes = [8, 128], strides = [1, 1]} : vector<8x512xf32> to vector<8x128xf32>
    %65 = math.tanh %64 : vector<8x128xf32>
    %66 = vector.extract_strided_slice %51 {offsets = [0, 384], sizes = [8, 128], strides = [1, 1]} : vector<8x512xf32> to vector<8x128xf32>
    %67 = arith.negf %66 : vector<8x128xf32>
    %68 = math.exp %67 : vector<8x128xf32>
    %cst_28 = arith.constant 1.000000e+00 : f32
    %69 = vector.broadcast %cst_28 : f32 to vector<8x128xf32>
    %70 = arith.addf %69, %68 : vector<8x128xf32>
    %71 = arith.divf %69, %70 : vector<8x128xf32>
    %72 = arith.mulf %63, %43 : vector<8x128xf32>
    %73 = arith.mulf %57, %65 : vector<8x128xf32>
    %74 = arith.addf %72, %73 : vector<8x128xf32>
    %75 = math.tanh %74 : vector<8x128xf32>
    %76 = arith.mulf %71, %75 : vector<8x128xf32>
    %c2_i32 = arith.constant 2 : i32
    %77 = arith.index_cast %c2_i32 : i32 to index
    %c0_29 = arith.constant 0 : index
    %c0_30 = arith.constant 0 : index
    %78 = vector.load %arg8[%77, %c0_29, %c0_30] : memref<8x8x512xf32, #tpu.memory_space<vmem>>, vector<1x8x512xf32>
    %79 = vector.shape_cast %78 : vector<1x8x512xf32> to vector<8x512xf32>
    %80 = arith.truncf %76 : vector<8x128xf32> to vector<8x128xbf16>
    %cst_31 = arith.constant dense<0.000000e+00> : vector<8x512xf32>
    %81 = tpu.matmul %80, %12, %cst_31 {dimension_numbers = #tpu.dot_dimension_numbers<[1], [0], [0], [1], [0, 0, 1, 1], [], []>} : vector<8x128xbf16>, vector<128x512xbf16>, vector<8x512xf32> -> vector<8x512xf32>
    %82 = arith.addf %79, %81 : vector<8x512xf32>
    %83 = vector.extract_strided_slice %82 {offsets = [0, 0], sizes = [8, 128], strides = [1, 1]} : vector<8x512xf32> to vector<8x128xf32>
    %84 = arith.negf %83 : vector<8x128xf32>
    %85 = math.exp %84 : vector<8x128xf32>
    %cst_32 = arith.constant 1.000000e+00 : f32
    %86 = vector.broadcast %cst_32 : f32 to vector<8x128xf32>
    %87 = arith.addf %86, %85 : vector<8x128xf32>
    %88 = arith.divf %86, %87 : vector<8x128xf32>
    %89 = vector.extract_strided_slice %82 {offsets = [0, 128], sizes = [8, 128], strides = [1, 1]} : vector<8x512xf32> to vector<8x128xf32>
    %90 = arith.negf %89 : vector<8x128xf32>
    %91 = math.exp %90 : vector<8x128xf32>
    %cst_33 = arith.constant 1.000000e+00 : f32
    %92 = vector.broadcast %cst_33 : f32 to vector<8x128xf32>
    %93 = arith.addf %92, %91 : vector<8x128xf32>
    %94 = arith.divf %92, %93 : vector<8x128xf32>
    %95 = vector.extract_strided_slice %82 {offsets = [0, 256], sizes = [8, 128], strides = [1, 1]} : vector<8x512xf32> to vector<8x128xf32>
    %96 = math.tanh %95 : vector<8x128xf32>
    %97 = vector.extract_strided_slice %82 {offsets = [0, 384], sizes = [8, 128], strides = [1, 1]} : vector<8x512xf32> to vector<8x128xf32>
    %98 = arith.negf %97 : vector<8x128xf32>
    %99 = math.exp %98 : vector<8x128xf32>
    %cst_34 = arith.constant 1.000000e+00 : f32
    %100 = vector.broadcast %cst_34 : f32 to vector<8x128xf32>
    %101 = arith.addf %100, %99 : vector<8x128xf32>
    %102 = arith.divf %100, %101 : vector<8x128xf32>
    %103 = arith.mulf %94, %74 : vector<8x128xf32>
    %104 = arith.mulf %88, %96 : vector<8x128xf32>
    %105 = arith.addf %103, %104 : vector<8x128xf32>
    %106 = math.tanh %105 : vector<8x128xf32>
    %107 = arith.mulf %102, %106 : vector<8x128xf32>
    %c3_i32 = arith.constant 3 : i32
    %108 = arith.index_cast %c3_i32 : i32 to index
    %c0_35 = arith.constant 0 : index
    %c0_36 = arith.constant 0 : index
    %109 = vector.load %arg8[%108, %c0_35, %c0_36] : memref<8x8x512xf32, #tpu.memory_space<vmem>>, vector<1x8x512xf32>
    %110 = vector.shape_cast %109 : vector<1x8x512xf32> to vector<8x512xf32>
    %111 = arith.truncf %107 : vector<8x128xf32> to vector<8x128xbf16>
    %cst_37 = arith.constant dense<0.000000e+00> : vector<8x512xf32>
    %112 = tpu.matmul %111, %12, %cst_37 {dimension_numbers = #tpu.dot_dimension_numbers<[1], [0], [0], [1], [0, 0, 1, 1], [], []>} : vector<8x128xbf16>, vector<128x512xbf16>, vector<8x512xf32> -> vector<8x512xf32>
    %113 = arith.addf %110, %112 : vector<8x512xf32>
    %114 = vector.extract_strided_slice %113 {offsets = [0, 0], sizes = [8, 128], strides = [1, 1]} : vector<8x512xf32> to vector<8x128xf32>
    %115 = arith.negf %114 : vector<8x128xf32>
    %116 = math.exp %115 : vector<8x128xf32>
    %cst_38 = arith.constant 1.000000e+00 : f32
    %117 = vector.broadcast %cst_38 : f32 to vector<8x128xf32>
    %118 = arith.addf %117, %116 : vector<8x128xf32>
    %119 = arith.divf %117, %118 : vector<8x128xf32>
    %120 = vector.extract_strided_slice %113 {offsets = [0, 128], sizes = [8, 128], strides = [1, 1]} : vector<8x512xf32> to vector<8x128xf32>
    %121 = arith.negf %120 : vector<8x128xf32>
    %122 = math.exp %121 : vector<8x128xf32>
    %cst_39 = arith.constant 1.000000e+00 : f32
    %123 = vector.broadcast %cst_39 : f32 to vector<8x128xf32>
    %124 = arith.addf %123, %122 : vector<8x128xf32>
    %125 = arith.divf %123, %124 : vector<8x128xf32>
    %126 = vector.extract_strided_slice %113 {offsets = [0, 256], sizes = [8, 128], strides = [1, 1]} : vector<8x512xf32> to vector<8x128xf32>
    %127 = math.tanh %126 : vector<8x128xf32>
    %128 = vector.extract_strided_slice %113 {offsets = [0, 384], sizes = [8, 128], strides = [1, 1]} : vector<8x512xf32> to vector<8x128xf32>
    %129 = arith.negf %128 : vector<8x128xf32>
    %130 = math.exp %129 : vector<8x128xf32>
    %cst_40 = arith.constant 1.000000e+00 : f32
    %131 = vector.broadcast %cst_40 : f32 to vector<8x128xf32>
    %132 = arith.addf %131, %130 : vector<8x128xf32>
    %133 = arith.divf %131, %132 : vector<8x128xf32>
    %134 = arith.mulf %125, %105 : vector<8x128xf32>
    %135 = arith.mulf %119, %127 : vector<8x128xf32>
    %136 = arith.addf %134, %135 : vector<8x128xf32>
    %137 = math.tanh %136 : vector<8x128xf32>
    %138 = arith.mulf %133, %137 : vector<8x128xf32>
    %c4_i32 = arith.constant 4 : i32
    %139 = arith.index_cast %c4_i32 : i32 to index
    %c0_41 = arith.constant 0 : index
    %c0_42 = arith.constant 0 : index
    %140 = vector.load %arg8[%139, %c0_41, %c0_42] : memref<8x8x512xf32, #tpu.memory_space<vmem>>, vector<1x8x512xf32>
    %141 = vector.shape_cast %140 : vector<1x8x512xf32> to vector<8x512xf32>
    %142 = arith.truncf %138 : vector<8x128xf32> to vector<8x128xbf16>
    %cst_43 = arith.constant dense<0.000000e+00> : vector<8x512xf32>
    %143 = tpu.matmul %142, %12, %cst_43 {dimension_numbers = #tpu.dot_dimension_numbers<[1], [0], [0], [1], [0, 0, 1, 1], [], []>} : vector<8x128xbf16>, vector<128x512xbf16>, vector<8x512xf32> -> vector<8x512xf32>
    %144 = arith.addf %141, %143 : vector<8x512xf32>
    %145 = vector.extract_strided_slice %144 {offsets = [0, 0], sizes = [8, 128], strides = [1, 1]} : vector<8x512xf32> to vector<8x128xf32>
    %146 = arith.negf %145 : vector<8x128xf32>
    %147 = math.exp %146 : vector<8x128xf32>
    %cst_44 = arith.constant 1.000000e+00 : f32
    %148 = vector.broadcast %cst_44 : f32 to vector<8x128xf32>
    %149 = arith.addf %148, %147 : vector<8x128xf32>
    %150 = arith.divf %148, %149 : vector<8x128xf32>
    %151 = vector.extract_strided_slice %144 {offsets = [0, 128], sizes = [8, 128], strides = [1, 1]} : vector<8x512xf32> to vector<8x128xf32>
    %152 = arith.negf %151 : vector<8x128xf32>
    %153 = math.exp %152 : vector<8x128xf32>
    %cst_45 = arith.constant 1.000000e+00 : f32
    %154 = vector.broadcast %cst_45 : f32 to vector<8x128xf32>
    %155 = arith.addf %154, %153 : vector<8x128xf32>
    %156 = arith.divf %154, %155 : vector<8x128xf32>
    %157 = vector.extract_strided_slice %144 {offsets = [0, 256], sizes = [8, 128], strides = [1, 1]} : vector<8x512xf32> to vector<8x128xf32>
    %158 = math.tanh %157 : vector<8x128xf32>
    %159 = vector.extract_strided_slice %144 {offsets = [0, 384], sizes = [8, 128], strides = [1, 1]} : vector<8x512xf32> to vector<8x128xf32>
    %160 = arith.negf %159 : vector<8x128xf32>
    %161 = math.exp %160 : vector<8x128xf32>
    %cst_46 = arith.constant 1.000000e+00 : f32
    %162 = vector.broadcast %cst_46 : f32 to vector<8x128xf32>
    %163 = arith.addf %162, %161 : vector<8x128xf32>
    %164 = arith.divf %162, %163 : vector<8x128xf32>
    %165 = arith.mulf %156, %136 : vector<8x128xf32>
    %166 = arith.mulf %150, %158 : vector<8x128xf32>
    %167 = arith.addf %165, %166 : vector<8x128xf32>
    %168 = math.tanh %167 : vector<8x128xf32>
    %169 = arith.mulf %164, %168 : vector<8x128xf32>
    %c5_i32 = arith.constant 5 : i32
    %170 = arith.index_cast %c5_i32 : i32 to index
    %c0_47 = arith.constant 0 : index
    %c0_48 = arith.constant 0 : index
    %171 = vector.load %arg8[%170, %c0_47, %c0_48] : memref<8x8x512xf32, #tpu.memory_space<vmem>>, vector<1x8x512xf32>
    %172 = vector.shape_cast %171 : vector<1x8x512xf32> to vector<8x512xf32>
    %173 = arith.truncf %169 : vector<8x128xf32> to vector<8x128xbf16>
    %cst_49 = arith.constant dense<0.000000e+00> : vector<8x512xf32>
    %174 = tpu.matmul %173, %12, %cst_49 {dimension_numbers = #tpu.dot_dimension_numbers<[1], [0], [0], [1], [0, 0, 1, 1], [], []>} : vector<8x128xbf16>, vector<128x512xbf16>, vector<8x512xf32> -> vector<8x512xf32>
    %175 = arith.addf %172, %174 : vector<8x512xf32>
    %176 = vector.extract_strided_slice %175 {offsets = [0, 0], sizes = [8, 128], strides = [1, 1]} : vector<8x512xf32> to vector<8x128xf32>
    %177 = arith.negf %176 : vector<8x128xf32>
    %178 = math.exp %177 : vector<8x128xf32>
    %cst_50 = arith.constant 1.000000e+00 : f32
    %179 = vector.broadcast %cst_50 : f32 to vector<8x128xf32>
    %180 = arith.addf %179, %178 : vector<8x128xf32>
    %181 = arith.divf %179, %180 : vector<8x128xf32>
    %182 = vector.extract_strided_slice %175 {offsets = [0, 128], sizes = [8, 128], strides = [1, 1]} : vector<8x512xf32> to vector<8x128xf32>
    %183 = arith.negf %182 : vector<8x128xf32>
    %184 = math.exp %183 : vector<8x128xf32>
    %cst_51 = arith.constant 1.000000e+00 : f32
    %185 = vector.broadcast %cst_51 : f32 to vector<8x128xf32>
    %186 = arith.addf %185, %184 : vector<8x128xf32>
    %187 = arith.divf %185, %186 : vector<8x128xf32>
    %188 = vector.extract_strided_slice %175 {offsets = [0, 256], sizes = [8, 128], strides = [1, 1]} : vector<8x512xf32> to vector<8x128xf32>
    %189 = math.tanh %188 : vector<8x128xf32>
    %190 = vector.extract_strided_slice %175 {offsets = [0, 384], sizes = [8, 128], strides = [1, 1]} : vector<8x512xf32> to vector<8x128xf32>
    %191 = arith.negf %190 : vector<8x128xf32>
    %192 = math.exp %191 : vector<8x128xf32>
    %cst_52 = arith.constant 1.000000e+00 : f32
    %193 = vector.broadcast %cst_52 : f32 to vector<8x128xf32>
    %194 = arith.addf %193, %192 : vector<8x128xf32>
    %195 = arith.divf %193, %194 : vector<8x128xf32>
    %196 = arith.mulf %187, %167 : vector<8x128xf32>
    %197 = arith.mulf %181, %189 : vector<8x128xf32>
    %198 = arith.addf %196, %197 : vector<8x128xf32>
    %199 = math.tanh %198 : vector<8x128xf32>
    %200 = arith.mulf %195, %199 : vector<8x128xf32>
    %c6_i32 = arith.constant 6 : i32
    %201 = arith.index_cast %c6_i32 : i32 to index
    %c0_53 = arith.constant 0 : index
    %c0_54 = arith.constant 0 : index
    %202 = vector.load %arg8[%201, %c0_53, %c0_54] : memref<8x8x512xf32, #tpu.memory_space<vmem>>, vector<1x8x512xf32>
    %203 = vector.shape_cast %202 : vector<1x8x512xf32> to vector<8x512xf32>
    %204 = arith.truncf %200 : vector<8x128xf32> to vector<8x128xbf16>
    %cst_55 = arith.constant dense<0.000000e+00> : vector<8x512xf32>
    %205 = tpu.matmul %204, %12, %cst_55 {dimension_numbers = #tpu.dot_dimension_numbers<[1], [0], [0], [1], [0, 0, 1, 1], [], []>} : vector<8x128xbf16>, vector<128x512xbf16>, vector<8x512xf32> -> vector<8x512xf32>
    %206 = arith.addf %203, %205 : vector<8x512xf32>
    %207 = vector.extract_strided_slice %206 {offsets = [0, 0], sizes = [8, 128], strides = [1, 1]} : vector<8x512xf32> to vector<8x128xf32>
    %208 = arith.negf %207 : vector<8x128xf32>
    %209 = math.exp %208 : vector<8x128xf32>
    %cst_56 = arith.constant 1.000000e+00 : f32
    %210 = vector.broadcast %cst_56 : f32 to vector<8x128xf32>
    %211 = arith.addf %210, %209 : vector<8x128xf32>
    %212 = arith.divf %210, %211 : vector<8x128xf32>
    %213 = vector.extract_strided_slice %206 {offsets = [0, 128], sizes = [8, 128], strides = [1, 1]} : vector<8x512xf32> to vector<8x128xf32>
    %214 = arith.negf %213 : vector<8x128xf32>
    %215 = math.exp %214 : vector<8x128xf32>
    %cst_57 = arith.constant 1.000000e+00 : f32
    %216 = vector.broadcast %cst_57 : f32 to vector<8x128xf32>
    %217 = arith.addf %216, %215 : vector<8x128xf32>
    %218 = arith.divf %216, %217 : vector<8x128xf32>
    %219 = vector.extract_strided_slice %206 {offsets = [0, 256], sizes = [8, 128], strides = [1, 1]} : vector<8x512xf32> to vector<8x128xf32>
    %220 = math.tanh %219 : vector<8x128xf32>
    %221 = vector.extract_strided_slice %206 {offsets = [0, 384], sizes = [8, 128], strides = [1, 1]} : vector<8x512xf32> to vector<8x128xf32>
    %222 = arith.negf %221 : vector<8x128xf32>
    %223 = math.exp %222 : vector<8x128xf32>
    %cst_58 = arith.constant 1.000000e+00 : f32
    %224 = vector.broadcast %cst_58 : f32 to vector<8x128xf32>
    %225 = arith.addf %224, %223 : vector<8x128xf32>
    %226 = arith.divf %224, %225 : vector<8x128xf32>
    %227 = arith.mulf %218, %198 : vector<8x128xf32>
    %228 = arith.mulf %212, %220 : vector<8x128xf32>
    %229 = arith.addf %227, %228 : vector<8x128xf32>
    %230 = math.tanh %229 : vector<8x128xf32>
    %231 = arith.mulf %226, %230 : vector<8x128xf32>
    %c7_i32 = arith.constant 7 : i32
    %232 = arith.index_cast %c7_i32 : i32 to index
    %c0_59 = arith.constant 0 : index
    %c0_60 = arith.constant 0 : index
    %233 = vector.load %arg8[%232, %c0_59, %c0_60] : memref<8x8x512xf32, #tpu.memory_space<vmem>>, vector<1x8x512xf32>
    %234 = vector.shape_cast %233 : vector<1x8x512xf32> to vector<8x512xf32>
    %235 = arith.truncf %231 : vector<8x128xf32> to vector<8x128xbf16>
    %cst_61 = arith.constant dense<0.000000e+00> : vector<8x512xf32>
    %236 = tpu.matmul %235, %12, %cst_61 {dimension_numbers = #tpu.dot_dimension_numbers<[1], [0], [0], [1], [0, 0, 1, 1], [], []>} : vector<8x128xbf16>, vector<128x512xbf16>, vector<8x512xf32> -> vector<8x512xf32>
    %237 = arith.addf %234, %236 : vector<8x512xf32>
    %238 = vector.extract_strided_slice %237 {offsets = [0, 0], sizes = [8, 128], strides = [1, 1]} : vector<8x512xf32> to vector<8x128xf32>
    %239 = arith.negf %238 : vector<8x128xf32>
    %240 = math.exp %239 : vector<8x128xf32>
    %cst_62 = arith.constant 1.000000e+00 : f32
    %241 = vector.broadcast %cst_62 : f32 to vector<8x128xf32>
    %242 = arith.addf %241, %240 : vector<8x128xf32>
    %243 = arith.divf %241, %242 : vector<8x128xf32>
    %244 = vector.extract_strided_slice %237 {offsets = [0, 128], sizes = [8, 128], strides = [1, 1]} : vector<8x512xf32> to vector<8x128xf32>
    %245 = arith.negf %244 : vector<8x128xf32>
    %246 = math.exp %245 : vector<8x128xf32>
    %cst_63 = arith.constant 1.000000e+00 : f32
    %247 = vector.broadcast %cst_63 : f32 to vector<8x128xf32>
    %248 = arith.addf %247, %246 : vector<8x128xf32>
    %249 = arith.divf %247, %248 : vector<8x128xf32>
    %250 = vector.extract_strided_slice %237 {offsets = [0, 256], sizes = [8, 128], strides = [1, 1]} : vector<8x512xf32> to vector<8x128xf32>
    %251 = math.tanh %250 : vector<8x128xf32>
    %252 = vector.extract_strided_slice %237 {offsets = [0, 384], sizes = [8, 128], strides = [1, 1]} : vector<8x512xf32> to vector<8x128xf32>
    %253 = arith.negf %252 : vector<8x128xf32>
    %254 = math.exp %253 : vector<8x128xf32>
    %cst_64 = arith.constant 1.000000e+00 : f32
    %255 = vector.broadcast %cst_64 : f32 to vector<8x128xf32>
    %256 = arith.addf %255, %254 : vector<8x128xf32>
    %257 = arith.divf %255, %256 : vector<8x128xf32>
    %258 = arith.mulf %249, %229 : vector<8x128xf32>
    %259 = arith.mulf %243, %251 : vector<8x128xf32>
    %260 = arith.addf %258, %259 : vector<8x128xf32>
    %261 = math.tanh %260 : vector<8x128xf32>
    %262 = arith.mulf %257, %261 : vector<8x128xf32>
    %c8_i32 = arith.constant 8 : i32
    %c0_65 = arith.constant 0 : index
    %c0_66 = arith.constant 0 : index
    %263 = vector.load %arg9[%c0_65, %c0_66] : memref<8x128xf32, #tpu.memory_space<vmem>>, vector<8x128xf32>
    tpu.vector_store %arg9[%c0_65, %c0_66], %262 {strides = array<i32>} : memref<8x128xf32, #tpu.memory_space<vmem>>, vector<8x128xf32>,
    %c0_67 = arith.constant 0 : index
    %c0_68 = arith.constant 0 : index
    %264 = vector.load %arg10[%c0_67, %c0_68] : memref<8x128xf32, #tpu.memory_space<vmem>>, vector<8x128xf32>
    tpu.vector_store %arg10[%c0_67, %c0_68], %260 {strides = array<i32>} : memref<8x128xf32, #tpu.memory_space<vmem>>, vector<8x128xf32>,
    %c0_i32_69 = arith.constant 0 : i32
    %265 = arith.cmpi eq, %arg0, %c0_i32_69 : i32
    %266 = arith.extui %265 : i1 to i32
    %c0_i32_70 = arith.constant 0 : i32
    %267 = arith.cmpi ne, %266, %c0_i32_70 : i32
    scf.if %267 {
      %268 = arith.truncf %262 : vector<8x128xf32> to vector<8x128xbf16>
      %c0_71 = arith.constant 0 : index
      %c0_72 = arith.constant 0 : index
      %269 = vector.load %arg5[%c0_71, %c0_72] : memref<128x128xbf16, #tpu.memory_space<vmem>>, vector<128x128xbf16>
      %cst_73 = arith.constant dense<0.000000e+00> : vector<8x128xf32>
      %270 = tpu.matmul %268, %269, %cst_73 {dimension_numbers = #tpu.dot_dimension_numbers<[1], [0], [0], [1], [0, 0, 1, 1], [], []>} : vector<8x128xbf16>, vector<128x128xbf16>, vector<8x128xf32> -> vector<8x128xf32>
      %c0_74 = arith.constant 0 : index
      %c0_75 = arith.constant 0 : index
      %271 = vector.load %arg6[%c0_74, %c0_75] : memref<1x128xf32, #tpu.memory_space<vmem>>, vector<1x128xf32>
      %272 = vector.broadcast %271 : vector<1x128xf32> to vector<8x128xf32>
      %273 = arith.addf %270, %272 : vector<8x128xf32>
      %c0_76 = arith.constant 0 : index
      %c0_77 = arith.constant 0 : index
      %274 = vector.load %arg7[%c0_76, %c0_77] : memref<8x128xf32, #tpu.memory_space<vmem>>, vector<8x128xf32>
      tpu.vector_store %arg7[%c0_76, %c0_77], %273 {strides = array<i32>} : memref<8x128xf32, #tpu.memory_space<vmem>>, vector<8x128xf32>,
    } else {
    }
    return
  }
  func.func @transform_0(%arg0: i32) -> (i32, i32, i32) {
    %c0_i32 = arith.constant 0 : i32
    %c0_i32_0 = arith.constant 0 : i32
    %c0_i32_1 = arith.constant 0 : i32
    return %arg0, %c0_i32, %c0_i32_0 : i32, i32, i32
  }
  func.func @transform_1(%arg0: i32) -> (i32, i32) {
    %c0_i32 = arith.constant 0 : i32
    %c0_i32_0 = arith.constant 0 : i32
    %c0_i32_1 = arith.constant 0 : i32
    return %c0_i32, %c0_i32_0 : i32, i32
  }
  func.func @transform_2(%arg0: i32) -> (i32, i32) {
    %c0_i32 = arith.constant 0 : i32
    %c0_i32_0 = arith.constant 0 : i32
    %c0_i32_1 = arith.constant 0 : i32
    return %c0_i32, %c0_i32_0 : i32, i32
  }
  func.func @transform_3(%arg0: i32) -> (i32, i32) {
    %c0_i32 = arith.constant 0 : i32
    %c0_i32_0 = arith.constant 0 : i32
    %c0_i32_1 = arith.constant 0 : i32
    return %c0_i32, %c0_i32_0 : i32, i32
  }
  func.func @transform_4(%arg0: i32) -> (i32, i32) {
    %c0_i32 = arith.constant 0 : i32
    %c0_i32_0 = arith.constant 0 : i32
    %c0_i32_1 = arith.constant 0 : i32
    return %c0_i32, %c0_i32_0 : i32, i32
  }
  func.func @transform_5(%arg0: i32) -> (i32, i32) {
    %c0_i32 = arith.constant 0 : i32
    %c0_i32_0 = arith.constant 0 : i32
    %c0_i32_1 = arith.constant 0 : i32
    return %c0_i32, %c0_i32_0 : i32, i32
  }
  func.func @transform_6(%arg0: i32) -> (i32, i32) {
    %c0_i32 = arith.constant 0 : i32
    %c0_i32_0 = arith.constant 0 : i32
    %c0_i32_1 = arith.constant 0 : i32
    return %c0_i32, %c0_i32_0 : i32, i32
  }
}

</mosaic_0001>

<bundles_post_ra>
// kernel: lstm_rnn_forward.1
= control target key start
LH: loop header
LB: loop body
LE: loop exit
PB: predicated region body
PF: predicated region fallthrough
CT: control target
= control target key end

     0   :  { %s3163_s1 = inlined_call_operand.vmem [shape: bf16[128,512], index: 1, kind: input, shape index: {}]   ;;  %s3164_s2 = inlined_call_operand.vmem [shape: bf16[128,512], index: 2, kind: input, shape index: {}]   ;;  %s3165_s0 = inlined_call_operand.vmem [shape: bf16[8,8,128], index: 0, kind: input, shape index: {}]   ;;  %s3166_s3 = inlined_call_operand.vmem [shape: f32[1,512], index: 3, kind: input, shape index: {}]   ;;  %s3167_s5 = inlined_call_operand.vmem [shape: f32[1,128], index: 5, kind: input, shape index: {}]   ;;  %s3168_s4 = inlined_call_operand.vmem [shape: bf16[128,128], index: 4, kind: input, shape index: {}]   ;;  %s3169_s6 = inlined_call_operand.vmem [shape: f32[8,128], index: 6, kind: output, shape index: {}]  }
   0x1   :  { %v1826_v0 = vld [vmem:[%s3163_s1 + $0xe0] sm:$0xf]  ;;  %v2058_v1 = vld [vmem:[%s3163_s1 + $0xec] sm:$0xf0]  ;;  %v2056_v2 = vld [vmem:[%s3163_s1 + $0xe4] sm:$0xf] }
   0x2   :  { %v1827_v3 = vor.u32 %v2058_v1, %v1826_v0  ;;  %v1828_v4 = vld [vmem:[%s3163_s1 + $0xf0] sm:$0xf0]  ;;  %v1834_v5 = vld [vmem:[%s3163_s1 + $0xe8] sm:$0xf]  ;;  %v2059_v6 = vld [vmem:[%s3163_s1 + $0xf4] sm:$0xf0] }
   0x3   :  { %v1831_v7 = vor.u32 %v2056_v2, %v1828_v4  ;;  %v1835_v8 = vor.u32 %v2059_v6, %v1834_v5  ;;  %v2057_v9 = vld [vmem:[%s3163_s1 + $0xec] sm:$0xf]  ;;  %v1836_v10 = vld [vmem:[%s3163_s1 + $0xf8] sm:$0xf0]  ;;  %v1810_v11 = vld [vmem:[%s3163_s1 + $0xc0] sm:$0xf] }
   0x4   :  { %263 = vmatpush.bf16.msra.mxu0 %v1827_v3  ;;  %v1839_v12 = vor.u32 %v2057_v9, %v1836_v10  ;;  %v2054_v13 = vld [vmem:[%s3163_s1 + $0xcc] sm:$0xf0]  ;;  %v2052_v14 = vld [vmem:[%s3163_s1 + $0xc4] sm:$0xf]  ;;  %v1812_v15 = vld [vmem:[%s3163_s1 + $0xd0] sm:$0xf0] }
   0x5   :  { %292 = vmatpush.bf16.msra.mxu1 %v1831_v7  ;;  %321 = vmatpush.bf16.msra.mxu2 %v1835_v8  ;;  %v1811_v16 = vor.u32 %v2054_v13, %v1810_v11  ;;  %v1815_v17 = vor.u32 %v2052_v14, %v1812_v15  ;;  %v1818_v18 = vld [vmem:[%s3163_s1 + $0xc8] sm:$0xf]  ;;  %v2055_v19 = vld [vmem:[%s3163_s1 + $0xd4] sm:$0xf0]  ;;  %v2053_v20 = vld [vmem:[%s3163_s1 + $0xcc] sm:$0xf] }
   0x6   :  { %350 = vmatpush.bf16.msra.mxu3 %v1839_v12  ;;  %v1819_v21 = vor.u32 %v2055_v19, %v1818_v18  ;;  %v1820_v22 = vld [vmem:[%s3163_s1 + $0xd8] sm:$0xf0]  ;;  %v1794_v23 = vld [vmem:[%s3163_s1 + $0xa0] sm:$0xf]  ;;  %v2050_v24 = vld [vmem:[%s3163_s1 + $0xac] sm:$0xf0] }
   0x7   :  { %v1823_v25 = vor.u32 %v2053_v20, %v1820_v22  ;;  %v2048_v26 = vld [vmem:[%s3163_s1 + $0xa4] sm:$0xf]  ;;  %v1796_v27 = vld [vmem:[%s3163_s1 + $0xb0] sm:$0xf0]  ;;  %v1802_v28 = vld [vmem:[%s3163_s1 + $0xa8] sm:$0xf]  ;;  %v1795_v29 = vor.u32 %v2050_v24, %v1794_v23 }
   0x8   :  { %264 = vmatpush.bf16.msra.mxu0 %v1811_v16  ;;  %v2051_v30 = vld [vmem:[%s3163_s1 + $0xb4] sm:$0xf0]  ;;  %v2049_v31 = vld [vmem:[%s3163_s1 + $0xac] sm:$0xf]  ;;  %v1804_v32 = vld [vmem:[%s3163_s1 + $0xb8] sm:$0xf0]  ;;  %v1799_v33 = vor.u32 %v2048_v26, %v1796_v27 }
   0x9   :  { %293 = vmatpush.bf16.msra.mxu1 %v1815_v17  ;;  %322 = vmatpush.bf16.msra.mxu2 %v1819_v21  ;;  %v1803_v34 = vor.u32 %v2051_v30, %v1802_v28  ;;  %v1778_v35 = vld [vmem:[%s3163_s1 + $0x80] sm:$0xf]  ;;  %v2046_v36 = vld [vmem:[%s3163_s1 + $0x8c] sm:$0xf0]  ;;  %v2044_v37 = vld [vmem:[%s3163_s1 + $0x84] sm:$0xf]  ;;  %v1807_v38 = vor.u32 %v2049_v31, %v1804_v32 }
   0xa   :  { %351 = vmatpush.bf16.msra.mxu3 %v1823_v25  ;;  %v1780_v39 = vld [vmem:[%s3163_s1 + $0x90] sm:$0xf0]  ;;  %v1786_v40 = vld [vmem:[%s3163_s1 + $0x88] sm:$0xf]  ;;  %v2047_v41 = vld [vmem:[%s3163_s1 + $0x94] sm:$0xf0]  ;;  %v1779_v44 = vor.u32 %v2046_v36, %v1778_v35 }
   0xb   :  { %v2045_v42 = vld [vmem:[%s3163_s1 + $0x8c] sm:$0xf]  ;;  %v1788_v43 = vld [vmem:[%s3163_s1 + $0x98] sm:$0xf0]  ;;  %v1783_v45 = vor.u32 %v2044_v37, %v1780_v39  ;;  %v1787_v46 = vor.u32 %v2047_v41, %v1786_v40  ;;  %v1762_v47 = vld [vmem:[%s3163_s1 + $0x60] sm:$0xf] }
   0xc   :  { %265 = vmatpush.bf16.msra.mxu0 %v1795_v29  ;;  %v2042_v48 = vld [vmem:[%s3163_s1 + $0x6c] sm:$0xf0]  ;;  %v2040_v49 = vld [vmem:[%s3163_s1 + $0x64] sm:$0xf]  ;;  %v1791_v50 = vor.u32 %v2045_v42, %v1788_v43  ;;  %v1764_v51 = vld [vmem:[%s3163_s1 + $0x70] sm:$0xf0] }
   0xd   :  { %294 = vmatpush.bf16.msra.mxu1 %v1799_v33  ;;  %323 = vmatpush.bf16.msra.mxu2 %v1803_v34  ;;  %v1770_v52 = vld [vmem:[%s3163_s1 + $0x68] sm:$0xf]  ;;  %v2043_v53 = vld [vmem:[%s3163_s1 + $0x74] sm:$0xf0]  ;;  %v2041_v54 = vld [vmem:[%s3163_s1 + $0x6c] sm:$0xf]  ;;  %v1763_v56 = vor.u32 %v2042_v48, %v1762_v47  ;;  %v1767_v57 = vor.u32 %v2040_v49, %v1764_v51 }
   0xe   :  { %352 = vmatpush.bf16.msra.mxu3 %v1807_v38  ;;  %v1772_v55 = vld [vmem:[%s3163_s1 + $0x78] sm:$0xf0]  ;;  %v1771_v58 = vor.u32 %v2043_v53, %v1770_v52  ;;  %v1746_v59 = vld [vmem:[%s3163_s1 + $0x40] sm:$0xf]  ;;  %v2038_v60 = vld [vmem:[%s3163_s1 + $0x4c] sm:$0xf0] }
   0xf   :  { %v2036_v61 = vld [vmem:[%s3163_s1 + $0x44] sm:$0xf]  ;;  %v1775_v62 = vor.u32 %v2041_v54, %v1772_v55  ;;  %v1748_v63 = vld [vmem:[%s3163_s1 + $0x50] sm:$0xf0]  ;;  %v1754_v0 = vld [vmem:[%s3163_s1 + $0x48] sm:$0xf]  ;;  %v1747_v4 = vor.u32 %v2038_v60, %v1746_v59 }
  0x10   :  { %266 = vmatpush.bf16.msra.mxu0 %v1779_v44  ;;  %v2039_v1 = vld [vmem:[%s3163_s1 + $0x54] sm:$0xf0]  ;;  %v2037_v2 = vld [vmem:[%s3163_s1 + $0x4c] sm:$0xf]  ;;  %v1756_v3 = vld [vmem:[%s3163_s1 + $0x58] sm:$0xf0]  ;;  %v1751_v5 = vor.u32 %v2036_v61, %v1748_v63 }
  0x11   :  { %295 = vmatpush.bf16.msra.mxu1 %v1783_v45  ;;  %324 = vmatpush.bf16.msra.mxu2 %v1787_v46  ;;  %v1755_v6 = vor.u32 %v2039_v1, %v1754_v0  ;;  %v1730_v7 = vld [vmem:[%s3163_s1 + $0x20] sm:$0xf]  ;;  %v2034_v8 = vld [vmem:[%s3163_s1 + $0x2c] sm:$0xf0]  ;;  %v2032_v9 = vld [vmem:[%s3163_s1 + $0x24] sm:$0xf]  ;;  %v1759_v10 = vor.u32 %v2037_v2, %v1756_v3 }
  0x12   :  { %353 = vmatpush.bf16.msra.mxu3 %v1791_v50  ;;  %v1732_v11 = vld [vmem:[%s3163_s1 + $0x30] sm:$0xf0]  ;;  %v1738_v12 = vld [vmem:[%s3163_s1 + $0x28] sm:$0xf]  ;;  %v2035_v13 = vld [vmem:[%s3163_s1 + $0x34] sm:$0xf0]  ;;  %v1731_v16 = vor.u32 %v2034_v8, %v1730_v7 }
  0x13   :  { %v2033_v14 = vld [vmem:[%s3163_s1 + $0x2c] sm:$0xf]  ;;  %v1740_v15 = vld [vmem:[%s3163_s1 + $0x38] sm:$0xf0]  ;;  %v1714_v17 = vld [vmem:[%s3163_s1] sm:$0xf]  ;;  %v1735_v18 = vor.u32 %v2032_v9, %v1732_v11  ;;  %v1739_v19 = vor.u32 %v2035_v13, %v1738_v12 }
  0x14   :  { %267 = vmatpush.bf16.msra.mxu0 %v1763_v56  ;;  %v2030_v20 = vld [vmem:[%s3163_s1 + $0xc] sm:$0xf0]  ;;  %v2028_v21 = vld [vmem:[%s3163_s1 + $0x4] sm:$0xf]  ;;  %v1716_v22 = vld [vmem:[%s3163_s1 + $0x10] sm:$0xf0]  ;;  %v1743_v23 = vor.u32 %v2033_v14, %v1740_v15 }
  0x15   :  { %296 = vmatpush.bf16.msra.mxu1 %v1767_v57  ;;  %325 = vmatpush.bf16.msra.mxu2 %v1771_v58  ;;  %v1722_v24 = vld [vmem:[%s3163_s1 + $0x8] sm:$0xf]  ;;  %v2031_v25 = vld [vmem:[%s3163_s1 + $0x14] sm:$0xf0]  ;;  %v2029_v26 = vld [vmem:[%s3163_s1 + $0xc] sm:$0xf]  ;;  %v1715_v30 = vor.u32 %v2030_v20, %v1714_v17  ;;  %v1719_v33 = vor.u32 %v2028_v21, %v1716_v22 }
  0x16   :  { %354 = vmatpush.bf16.msra.mxu3 %v1775_v62  ;;  %v1724_v27 = vld [vmem:[%s3163_s1 + $0x18] sm:$0xf0]  ;;  %v1954_v28 = vld [vmem:[%s3164_s2 + $0xe0] sm:$0xf]  ;;  %v2090_v29 = vld [vmem:[%s3164_s2 + $0xec] sm:$0xf0]  ;;  %v1723_v34 = vor.u32 %v2031_v25, %v1722_v24 }
  0x17   :  { %v2088_v31 = vld [vmem:[%s3164_s2 + $0xe4] sm:$0xf]  ;;  %v1956_v32 = vld [vmem:[%s3164_s2 + $0xf0] sm:$0xf0]  ;;  %v1727_v36 = vor.u32 %v2029_v26, %v1724_v27  ;;  %v2473_v37 = vor.u32 %v2090_v29, %v1954_v28  ;;  %v2089_v38 = vld [vmem:[%s3164_s2 + $0xec] sm:$0xf] }
  0x18   :  { %268 = vmatpush.bf16.msra.mxu0 %v1747_v4  ;;  %v2024_v35 = vld [vmem:[%s3165_s0] sm:$0xff]  ;;  %v1962_v39 = vld [vmem:[%s3164_s2 + $0xe8] sm:$0xf]  ;;  %v2091_v40 = vld [vmem:[%s3164_s2 + $0xf4] sm:$0xf0]  ;;  %v2484_v41 = vor.u32 %v2088_v31, %v1956_v32 }
  0x19   :  { %297 = vmatpush.bf16.msra.mxu1 %v1751_v5  ;;  %326 = vmatpush.bf16.msra.mxu2 %v1755_v6  ;;  %v1964_v42 = vld [vmem:[%s3164_s2 + $0xf8] sm:$0xf0]  ;;  %v1938_v43 = vld [vmem:[%s3164_s2 + $0xc0] sm:$0xf]  ;;  %v2086_v44 = vld [vmem:[%s3164_s2 + $0xcc] sm:$0xf0]  ;;  %v2501_v47 = vor.u32 %v2091_v40, %v1962_v39 }
  0x1a   :  { %355 = vmatpush.bf16.msra.mxu3 %v1759_v10  ;;  %v2084_v45 = vld [vmem:[%s3164_s2 + $0xc4] sm:$0xf]  ;;  %v1940_v46 = vld [vmem:[%s3164_s2 + $0xd0] sm:$0xf0]  ;;  %v2504_v48 = vor.u32 %v2089_v38, %v1964_v42  ;;  %v2506_v49 = vor.u32 %v2086_v44, %v1938_v43  ;;  %v2085_v50 = vld [vmem:[%s3164_s2 + $0xcc] sm:$0xf] }
  0x1b   :  { %v1946_v51 = vld [vmem:[%s3164_s2 + $0xc8] sm:$0xf]  ;;  %v2087_v52 = vld [vmem:[%s3164_s2 + $0xd4] sm:$0xf0]  ;;  %v2518_v53 = vor.u32 %v2084_v45, %v1940_v46  ;;  %v1948_v54 = vld [vmem:[%s3164_s2 + $0xd8] sm:$0xf0] }
  0x1c   :  { %269 = vmatpush.bf16.msra.mxu0 %v1731_v16  ;;  %v1922_v55 = vld [vmem:[%s3164_s2 + $0xa0] sm:$0xf]  ;;  %v2082_v56 = vld [vmem:[%s3164_s2 + $0xac] sm:$0xf0]  ;;  %v2080_v57 = vld [vmem:[%s3164_s2 + $0xa4] sm:$0xf]  ;;  %v2536_v59 = vor.u32 %v2087_v52, %v1946_v51  ;;  %v2540_v60 = vor.u32 %v2085_v50, %v1948_v54 }
  0x1d   :  { %298 = vmatpush.bf16.msra.mxu1 %v1735_v18  ;;  %327 = vmatpush.bf16.msra.mxu2 %v1739_v19  ;;  %v1924_v58 = vld [vmem:[%s3164_s2 + $0xb0] sm:$0xf0]  ;;  %v2542_v61 = vor.u32 %v2082_v56, %v1922_v55  ;;  %v2081_v62 = vld [vmem:[%s3164_s2 + $0xac] sm:$0xf]  ;;  %v1930_v63 = vld [vmem:[%s3164_s2 + $0xa8] sm:$0xf] }
  0x1e   :  { %356 = vmatpush.bf16.msra.mxu3 %v1743_v23  ;;  %v2083_v0 = vld [vmem:[%s3164_s2 + $0xb4] sm:$0xf0]  ;;  %v2554_v1 = vor.u32 %v2080_v57, %v1924_v58  ;;  %v1932_v2 = vld [vmem:[%s3164_s2 + $0xb8] sm:$0xf0]  ;;  %v1906_v3 = vld [vmem:[%s3164_s2 + $0x80] sm:$0xf] }
  0x1f   :  { %v2078_v4 = vld [vmem:[%s3164_s2 + $0x8c] sm:$0xf0]  ;;  %v2076_v5 = vld [vmem:[%s3164_s2 + $0x84] sm:$0xf]  ;;  %v1908_v6 = vld [vmem:[%s3164_s2 + $0x90] sm:$0xf0]  ;;  %v2572_v7 = vor.u32 %v2083_v0, %v1930_v63  ;;  %v2576_v8 = vor.u32 %v2081_v62, %v1932_v2 }
  0x20   :  { %270 = vmatpush.bf16.msra.mxu0 %v1715_v30  ;;  %v2578_v9 = vor.u32 %v2078_v4, %v1906_v3  ;;  %v2077_v10 = vld [vmem:[%s3164_s2 + $0x8c] sm:$0xf]  ;;  %v1914_v11 = vld [vmem:[%s3164_s2 + $0x88] sm:$0xf]  ;;  %v2079_v12 = vld [vmem:[%s3164_s2 + $0x94] sm:$0xf0]  ;;  %v2590_v13 = vor.u32 %v2076_v5, %v1908_v6 }
  0x21   :  { %299 = vmatpush.bf16.msra.mxu1 %v1719_v33  ;;  %328 = vmatpush.bf16.msra.mxu2 %v1723_v34  ;;  %v1916_v14 = vld [vmem:[%s3164_s2 + $0x98] sm:$0xf0]  ;;  %v1890_v15 = vld [vmem:[%s3164_s2 + $0x60] sm:$0xf]  ;;  %v2074_v16 = vld [vmem:[%s3164_s2 + $0x6c] sm:$0xf0]  ;;  %v2611_v20 = vor.u32 %v2079_v12, %v1914_v11 }
  0x22   :  { %357 = vmatpush.bf16.msra.mxu3 %v1727_v36  ;;  %v2072_v17 = vld [vmem:[%s3164_s2 + $0x64] sm:$0xf]  ;;  %v1892_v18 = vld [vmem:[%s3164_s2 + $0x70] sm:$0xf0]  ;;  %v2025_v19 = vld [vmem:[%s3165_s0 + $0x8] sm:$0xff]  ;;  %v2615_v21 = vor.u32 %v2077_v10, %v1916_v14  ;;  %v2617_v22 = vor.u32 %v2074_v16, %v1890_v15 }
  0x23   :  { %271 = vmatmul.bf16.vlgmr.msra.gmra.mxu0 %v2024_v35  ;;  %v2073_v23 = vld [vmem:[%s3164_s2 + $0x6c] sm:$0xf]  ;;  %v1898_v24 = vld [vmem:[%s3164_s2 + $0x68] sm:$0xf]  ;;  %v2075_v25 = vld [vmem:[%s3164_s2 + $0x74] sm:$0xf0]  ;;  %v2629_v26 = vor.u32 %v2072_v17, %v1892_v18 }
  0x24   :  { %610 = vmatpush.bf16.msrb.mxu0 %v2473_v37  ;;  %300 = vmatmul.bf16.vlgmr.msra.gmra.mxu1 %v2024_v35  ;;  %v1900_v27 = vld [vmem:[%s3164_s2 + $0x78] sm:$0xf0]  ;;  %v1874_v28 = vld [vmem:[%s3164_s2 + $0x40] sm:$0xf]  ;;  %v2070_v29 = vld [vmem:[%s3164_s2 + $0x4c] sm:$0xf0]  ;;  %v2647_v32 = vor.u32 %v2075_v25, %v1898_v24 }
  0x25   :  { %623 = vmatpush.bf16.msrb.mxu1 %v2484_v41  ;;  %329 = vmatmul.bf16.vlgmr.msra.gmra.mxu2 %v2024_v35  ;;  %v2068_v30 = vld [vmem:[%s3164_s2 + $0x44] sm:$0xf]  ;;  %v1876_v31 = vld [vmem:[%s3164_s2 + $0x50] sm:$0xf0]  ;;  %v2651_v33 = vor.u32 %v2073_v23, %v1900_v27  ;;  %v2653_v34 = vor.u32 %v2070_v29, %v1874_v28  ;;  %v2069_v36 = vld [vmem:[%s3164_s2 + $0x4c] sm:$0xf] }
  0x26   :  { %358 = vmatmul.bf16.vlgmr.msra.gmra.mxu3 %v2024_v35  ;;  %636 = vmatpush.bf16.msrb.mxu2 %v2501_v47  ;;  %v2656_v35 = vor.u32 %v2068_v30, %v1876_v31  ;;  %v1884_v38 = vld [vmem:[%s3164_s2 + $0x58] sm:$0xf0]  ;;  %v1858_v39 = vld [vmem:[%s3164_s2 + $0x20] sm:$0xf]  ;;  %v2066_v40 = vld [vmem:[%s3164_s2 + $0x2c] sm:$0xf0] }
  0x27   :  { %649 = vmatpush.bf16.msrb.mxu3 %v2504_v48  ;;  %v2064_v42 = vld [vmem:[%s3164_s2 + $0x24] sm:$0xf]  ;;  %v2676_v43 = vor.u32 %v2069_v36, %v1884_v38  ;;  %v2678_v44 = vor.u32 %v2066_v40, %v1858_v39  ;;  %v1860_v45 = vld [vmem:[%s3164_s2 + $0x30] sm:$0xf0]  ;;  %v1882_v46 = vld [vmem:[%s3164_s2 + $0x48] sm:$0xf] }
  0x28   :  { %611 = vmatpush.bf16.msrb.mxu0 %v2506_v49  ;;  %v2071_v50 = vld [vmem:[%s3164_s2 + $0x54] sm:$0xf0]  ;;  %v2690_v51 = vor.u32 %v2064_v42, %v1860_v45  ;;  %v2065_v54 = vld [vmem:[%s3164_s2 + $0x2c] sm:$0xf]  ;;  %v1868_v55 = vld [vmem:[%s3164_s2 + $0x38] sm:$0xf0] }
  0x29   :  { %624 = vmatpush.bf16.msrb.mxu1 %v2518_v53  ;;  %v2692_v52 = vor.u32 %v2071_v50, %v1882_v46  ;;  %v1842_v56 = vld [vmem:[%s3164_s2] sm:$0xf]  ;;  %v2062_v57 = vld [vmem:[%s3164_s2 + $0xc] sm:$0xf0]  ;;  %v2060_v58 = vld [vmem:[%s3164_s2 + $0x4] sm:$0xf]  ;;  %v2721_v2 = vor.u32 %v2065_v54, %v1868_v55 }
  0x2a   :  { %637 = vmatpush.bf16.msrb.mxu2 %v2536_v59  ;;  %v1844_v62 = vld [vmem:[%s3164_s2 + $0x10] sm:$0xf0]  ;;  %v1866_v63 = vld [vmem:[%s3164_s2 + $0x28] sm:$0xf]  ;;  %v2067_v0 = vld [vmem:[%s3164_s2 + $0x34] sm:$0xf0]  ;;  %v2723_v3 = vor.u32 %v2062_v57, %v1842_v56 }
  0x2b   :  { %650 = vmatpush.bf16.msrb.mxu3 %v2540_v60  ;;  %v2725_v4 = vor.u32 %v2067_v0, %v1866_v63  ;;  %v1850_v5 = vld [vmem:[%s3164_s2 + $0x8] sm:$0xf]  ;;  %v2063_v6 = vld [vmem:[%s3164_s2 + $0x14] sm:$0xf0]  ;;  %v2734_v10 = vor.u32 %v2060_v58, %v1844_v62  ;;  %v2061_v11 = vld [vmem:[%s3164_s2 + $0xc] sm:$0xf] }
  0x2c   :  { %612 = vmatpush.bf16.msrb.mxu0 %v2542_v61  ;;  %v1852_v12 = vld [vmem:[%s3164_s2 + $0x18] sm:$0xf0]  ;;  %v2743_v14 = vor.u32 %v2063_v6, %v1850_v5  ;;  %v2026_v16 = vld [vmem:[%s3165_s0 + $0x10] sm:$0xff]  ;;  %v2230_v18 = vmov 0.0|0.0   ;;  %v69_v24 = vld [vmem:[%s3166_s3] sm:$0xf] }
  0x2d   :  { %625 = vmatpush.bf16.msrb.mxu1 %v2554_v1  ;;  %v2747_v15 = vor.u32 %v2061_v11, %v1852_v12  ;;  %v2027_v17 = vld [vmem:[%s3165_s0 + $0x18] sm:$0xff]  ;;  %v72_v27 = vperm.slane %v69_v24, 1  ;;  %v2833_v36 = vperm.slane %v69_v24, 2  ;;  %v2835_v38 = vperm.slane %v69_v24, 0 }
  0x2e   :  { %638 = vmatpush.bf16.msrb.mxu2 %v2572_v7  ;;  %v2837_v39 = vperm.slane %v69_v24, 3 }
  0x2f   :  { %651 = vmatpush.bf16.msrb.mxu3 %v2576_v8 }
  0x30   :  { %613 = vmatpush.bf16.msrb.mxu0 %v2578_v9 }
  0x31   :  { %626 = vmatpush.bf16.msrb.mxu1 %v2590_v13 }
  0x32   :  { %639 = vmatpush.bf16.msrb.mxu2 %v2611_v20 }
  0x33   :  { %652 = vmatpush.bf16.msrb.mxu3 %v2615_v21  ;;  %276 = vmatmul.bf16.gmra.mxu0 %v2025_v19 }
  0x34   :  { %614 = vmatpush.bf16.msrb.mxu0 %v2617_v22  ;;  %305 = vmatmul.bf16.gmra.mxu1 %v2025_v19 }
  0x35   :  { %627 = vmatpush.bf16.msrb.mxu1 %v2629_v26  ;;  %334 = vmatmul.bf16.gmra.mxu2 %v2025_v19 }
  0x36   :  { %363 = vmatmul.bf16.gmra.mxu3 %v2025_v19  ;;  %640 = vmatpush.bf16.msrb.mxu2 %v2647_v32 }
  0x37   :  { %653 = vmatpush.bf16.msrb.mxu3 %v2651_v33 }
  0x38   :  { %615 = vmatpush.bf16.msrb.mxu0 %v2653_v34 }
  0x39   :  { %628 = vmatpush.bf16.msrb.mxu1 %v2656_v35 }
  0x3a   :  { %641 = vmatpush.bf16.msrb.mxu2 %v2692_v52 }
  0x3b   :  { %654 = vmatpush.bf16.msrb.mxu3 %v2676_v43 }
  0x3c   :  { %616 = vmatpush.bf16.msrb.mxu0 %v2678_v44 }
  0x3d   :  { %629 = vmatpush.bf16.msrb.mxu1 %v2690_v51 }
  0x3e   :  { %642 = vmatpush.bf16.msrb.mxu2 %v2725_v4 }
  0x3f   :  { %655 = vmatpush.bf16.msrb.mxu3 %v2721_v2 }
  0x40   :  { %617 = vmatpush.bf16.msrb.mxu0 %v2723_v3 }
  0x41   :  { %630 = vmatpush.bf16.msrb.mxu1 %v2734_v10 }
  0x42   :  { %643 = vmatpush.bf16.msrb.mxu2 %v2743_v14 }
  0x43   :  { %656 = vmatpush.bf16.msrb.mxu3 %v2747_v15  ;;  %281 = vmatmul.bf16.gmra.mxu0 %v2026_v16 }
  0x44   :  { %735 = vmatpush.bf16.msra.mxu0 %v2473_v37  ;;  %310 = vmatmul.bf16.gmra.mxu1 %v2026_v16 }
  0x45   :  { %748 = vmatpush.bf16.msra.mxu1 %v2484_v41  ;;  %339 = vmatmul.bf16.gmra.mxu2 %v2026_v16 }
  0x46   :  { %761 = vmatpush.bf16.msra.mxu2 %v2501_v47  ;;  %368 = vmatmul.bf16.gmra.mxu3 %v2026_v16 }
  0x47   :  { %774 = vmatpush.bf16.msra.mxu3 %v2504_v48 }
  0x48   :  { %736 = vmatpush.bf16.msra.mxu0 %v2506_v49 }
  0x49   :  { %749 = vmatpush.bf16.msra.mxu1 %v2518_v53 }
  0x4a   :  { %762 = vmatpush.bf16.msra.mxu2 %v2536_v59 }
  0x4b   :  { %775 = vmatpush.bf16.msra.mxu3 %v2540_v60 }
  0x4c   :  { %737 = vmatpush.bf16.msra.mxu0 %v2542_v61 }
  0x4d   :  { %750 = vmatpush.bf16.msra.mxu1 %v2554_v1 }
  0x4e   :  { %763 = vmatpush.bf16.msra.mxu2 %v2572_v7 }
  0x4f   :  { %776 = vmatpush.bf16.msra.mxu3 %v2576_v8 }
  0x50   :  { %738 = vmatpush.bf16.msra.mxu0 %v2578_v9 }
  0x51   :  { %751 = vmatpush.bf16.msra.mxu1 %v2590_v13 }
  0x52   :  { %764 = vmatpush.bf16.msra.mxu2 %v2611_v20 }
  0x53   :  { %777 = vmatpush.bf16.msra.mxu3 %v2615_v21  ;;  %286 = vmatmul.bf16.gmra.mxu0 %v2027_v17 }
  0x54   :  { %739 = vmatpush.bf16.msra.mxu0 %v2617_v22  ;;  %315 = vmatmul.bf16.gmra.mxu1 %v2027_v17 }
  0x55   :  { %752 = vmatpush.bf16.msra.mxu1 %v2629_v26  ;;  %344 = vmatmul.bf16.gmra.mxu2 %v2027_v17 }
  0x56   :  { %765 = vmatpush.bf16.msra.mxu2 %v2647_v32  ;;  %373 = vmatmul.bf16.gmra.mxu3 %v2027_v17 }
  0x57   :  { %778 = vmatpush.bf16.msra.mxu3 %v2651_v33 }
  0x58   :  { %740 = vmatpush.bf16.msra.mxu0 %v2653_v34 }
  0x59   :  { %753 = vmatpush.bf16.msra.mxu1 %v2656_v35 }
  0x5a   :  { %766 = vmatpush.bf16.msra.mxu2 %v2692_v52 }
  0x5b   :  { %779 = vmatpush.bf16.msra.mxu3 %v2676_v43 }
  0x5c   :  { %741 = vmatpush.bf16.msra.mxu0 %v2678_v44 }
  0x5d   :  { %754 = vmatpush.bf16.msra.mxu1 %v2690_v51 }
  0x5e   :  { %767 = vmatpush.bf16.msra.mxu2 %v2725_v4 }
  0x5f   :  { %780 = vmatpush.bf16.msra.mxu3 %v2721_v2 }
  0x60   :  { %742 = vmatpush.bf16.msra.mxu0 %v2723_v3 }
  0x61   :  { %755 = vmatpush.bf16.msra.mxu1 %v2734_v10 }
  0x62   :  { %768 = vmatpush.bf16.msra.mxu2 %v2743_v14 }
  0x63   :  { %781 = vmatpush.bf16.msra.mxu3 %v2747_v15  ;;  %618 = vmatmul.bf16.vlgmr.msrb.gmra.mxu0 %v2230_v18 }
  0x64   :  { %631 = vmatmul.bf16.vlgmr.msrb.gmra.mxu1 %v2230_v18  ;;  %860 = vmatpush.bf16.msrb.mxu0 %v2473_v37 }
  0x65   :  { %644 = vmatmul.bf16.vlgmr.msrb.gmra.mxu2 %v2230_v18  ;;  %873 = vmatpush.bf16.msrb.mxu1 %v2484_v41 }
  0x66   :  { %657 = vmatmul.bf16.vlgmr.msrb.gmra.mxu3 %v2230_v18  ;;  %886 = vmatpush.bf16.msrb.mxu2 %v2501_v47 }
  0x67   :  { %899 = vmatpush.bf16.msrb.mxu3 %v2504_v48 }
  0x68   :  { %861 = vmatpush.bf16.msrb.mxu0 %v2506_v49 }
  0x69   :  { %874 = vmatpush.bf16.msrb.mxu1 %v2518_v53 }
  0x6a   :  { %887 = vmatpush.bf16.msrb.mxu2 %v2536_v59 }
  0x6b   :  { %900 = vmatpush.bf16.msrb.mxu3 %v2540_v60 }
  0x6c   :  { %862 = vmatpush.bf16.msrb.mxu0 %v2542_v61 }
  0x6d   :  { %875 = vmatpush.bf16.msrb.mxu1 %v2554_v1 }
  0x6e   :  { %888 = vmatpush.bf16.msrb.mxu2 %v2572_v7 }
  0x6f   :  { %901 = vmatpush.bf16.msrb.mxu3 %v2576_v8 }
  0x70   :  { %863 = vmatpush.bf16.msrb.mxu0 %v2578_v9 }
  0x71   :  { %876 = vmatpush.bf16.msrb.mxu1 %v2590_v13 }
  0x72   :  { %889 = vmatpush.bf16.msrb.mxu2 %v2611_v20 }
  0x73   :  { %902 = vmatpush.bf16.msrb.mxu3 %v2615_v21 }
  0x74   :  { %864 = vmatpush.bf16.msrb.mxu0 %v2617_v22 }
  0x75   :  { %877 = vmatpush.bf16.msrb.mxu1 %v2629_v26 }
  0x76   :  { %890 = vmatpush.bf16.msrb.mxu2 %v2647_v32 }
  0x77   :  { %903 = vmatpush.bf16.msrb.mxu3 %v2651_v33 }
  0x78   :  { %865 = vmatpush.bf16.msrb.mxu0 %v2653_v34 }
  0x79   :  { %878 = vmatpush.bf16.msrb.mxu1 %v2656_v35 }
  0x7a   :  { %891 = vmatpush.bf16.msrb.mxu2 %v2692_v52 }
  0x7b   :  { %904 = vmatpush.bf16.msrb.mxu3 %v2676_v43 }
  0x7c   :  { %866 = vmatpush.bf16.msrb.mxu0 %v2678_v44 }
  0x7d   :  { %879 = vmatpush.bf16.msrb.mxu1 %v2690_v51 }
  0x7e   :  { %892 = vmatpush.bf16.msrb.mxu2 %v2725_v4 }
  0x7f   :  { %905 = vmatpush.bf16.msrb.mxu3 %v2721_v2 }
  0x80   :  { %867 = vmatpush.bf16.msrb.mxu0 %v2723_v3 }
  0x81   :  { %880 = vmatpush.bf16.msrb.mxu1 %v2734_v10 }
  0x82   :  { %893 = vmatpush.bf16.msrb.mxu2 %v2743_v14 }
  0x83   :  { %906 = vmatpush.bf16.msrb.mxu3 %v2747_v15 }
  0xa0   :  { %v272_v19 = vpop.f32.mrf.mxu0 }
  0xa1   :  { %v301_v23 = vpop.f32.mrf.mxu1 }
  0xa8   :  { %v2825_v25 = vpop.f32.mrf.mxu2  ;;  %v2829_v29 = vpop.f32.mrf.mxu0 }
  0xa9   :  { %v2827_v28 = vpop.f32.mrf.mxu3  ;;  %v303_v30 = vpop.f32.mrf.mxu1 }
  0xaa   :  { %v2831_v31 = vadd.f32 %v303_v30, %v72_v27 }
  0xb0   :  { %v332_v40 = vpop.f32.mrf.mxu2  ;;  %v277_v46 = vpop.f32.mrf.mxu0 }
  0xb1   :  { %v2840_v42 = vadd.f32 %v332_v40, %v2833_v36  ;;  %v361_v45 = vpop.f32.mrf.mxu3  ;;  %v2846_v54 = vadd.f32 %v277_v46, %v2835_v38  ;;  %v306_v55 = vpop.f32.mrf.mxu1 }
  0xb2   :  { %v2843_v50 = vadd.f32 %v361_v45, %v2837_v39  ;;  %v2848_v56 = vadd.f32 %v306_v55, %v72_v27 }
  0xb8   :  { %v335_v57 = vpop.f32.mrf.mxu2  ;;  %v279_v63 = vpop.f32.mrf.mxu0 }
  0xb9   :  { %v2851_v58 = vadd.f32 %v335_v57, %v2833_v36  ;;  %v364_v62 = vpop.f32.mrf.mxu3  ;;  %v2857_v5 = vadd.f32 %v279_v63, %v2835_v38  ;;  %v308_v6 = vpop.f32.mrf.mxu1 }
  0xba   :  { %v2854_v0 = vadd.f32 %v364_v62, %v2837_v39  ;;  %v2859_v11 = vadd.f32 %v308_v6, %v72_v27 }
  0xbb   :  { %3170 = vst [vmem:[#allocation5_spill] sm:$0xff] %v2851_v58 }
  0xbc   :  { %3171 = vst [vmem:[#allocation6_spill] sm:$0xff] %v2854_v0 }
  0xbd   :  { %3172 = vst [vmem:[#allocation7_spill] sm:$0xff] %v2857_v5 }
  0xbe   :  { %3173 = vst [vmem:[#allocation8_spill] sm:$0xff] %v2859_v11 }
  0xc0   :  { %v337_v12 = vpop.f32.mrf.mxu2  ;;  %v282_v18 = vpop.f32.mrf.mxu0 }
  0xc1   :  { %v2862_v16 = vadd.f32 %v337_v12, %v2833_v36  ;;  %v366_v17 = vpop.f32.mrf.mxu3  ;;  %v2868_v30 = vadd.f32 %v282_v18, %v2835_v38  ;;  %v311_v40 = vpop.f32.mrf.mxu1 }
  0xc2   :  { %v2865_v24 = vadd.f32 %v366_v17, %v2837_v39  ;;  %v2870_v45 = vadd.f32 %v311_v40, %v72_v27 }
  0xc3   :  { %3174 = vst [vmem:[#allocation9_spill] sm:$0xff] %v2862_v16 }
  0xc4   :  { %3175 = vst [vmem:[#allocation10_spill] sm:$0xff] %v2865_v24 }
  0xc5   :  { %3176 = vst [vmem:[#allocation11_spill] sm:$0xff] %v2868_v30 }
  0xc6   :  { %3177 = vst [vmem:[#allocation12_spill] sm:$0xff] %v2870_v45 }
  0xc8   :  { %v340_v46 = vpop.f32.mrf.mxu2  ;;  %v284_v62 = vpop.f32.mrf.mxu0 }
  0xc9   :  { %v2873_v55 = vadd.f32 %v340_v46, %v2833_v36  ;;  %v369_v57 = vpop.f32.mrf.mxu3  ;;  %v2879_v6 = vadd.f32 %v284_v62, %v2835_v38  ;;  %v313_v12 = vpop.f32.mrf.mxu1 }
  0xca   :  { %v2876_v63 = vadd.f32 %v369_v57, %v2837_v39  ;;  %v2881_v17 = vadd.f32 %v313_v12, %v72_v27 }
  0xcb   :  { %3178 = vst [vmem:[#allocation13_spill] sm:$0xff] %v2873_v55 }
  0xcc   :  { %3179 = vst [vmem:[#allocation14_spill] sm:$0xff] %v2876_v63 }
  0xcd   :  { %3180 = vst [vmem:[#allocation15_spill] sm:$0xff] %v2879_v6 }
  0xce   :  { %3181 = vst [vmem:[#allocation16_spill] sm:$0xff] %v2881_v17 }
  0xd0   :  { %v342_v18 = vpop.f32.mrf.mxu2  ;;  %v287_v45 = vpop.f32.mrf.mxu0 }
  0xd1   :  { %v2884_v30 = vadd.f32 %v342_v18, %v2833_v36  ;;  %v371_v40 = vpop.f32.mrf.mxu3  ;;  %v2890_v55 = vadd.f32 %v287_v45, %v2835_v38  ;;  %v316_v57 = vpop.f32.mrf.mxu1  ;;  %v273_v45 = vadd.f32 %v272_v19, %v2835_v38  ;;  %v360_v19 = vadd.f32 %v2827_v28, %v2837_v39 }
  0xd2   :  { %v2887_v46 = vadd.f32 %v371_v40, %v2837_v39  ;;  %v2892_v63 = vadd.f32 %v316_v57, %v72_v27  ;;  %v302_v57 = vadd.f32 %v301_v23, %v72_v27 }
  0xd3   :  { %3182 = vst [vmem:[#allocation17_spill] sm:$0xff] %v2884_v30 }
  0xd4   :  { %3183 = vst [vmem:[#allocation18_spill] sm:$0xff] %v2887_v46 }
  0xd5   :  { %3184 = vst [vmem:[#allocation19_spill] sm:$0xff] %v2890_v55 }
  0xd6   :  { %3185 = vst [vmem:[#allocation20_spill] sm:$0xff] %v2892_v63 }
  0xd8   :  { %v345_v62 = vpop.f32.mrf.mxu2  ;;  %v289_v17 = vpop.f32.mrf.mxu0 }
  0xd9   :  { %v2895_v6 = vadd.f32 %v345_v62, %v2833_v36  ;;  %v374_v12 = vpop.f32.mrf.mxu3  ;;  %v2901_v30 = vadd.f32 %v289_v17, %v2835_v38  ;;  %v318_v40 = vpop.f32.mrf.mxu1 }
  0xda   :  { %v2898_v18 = vadd.f32 %v374_v12, %v2837_v39  ;;  %v2903_v46 = vadd.f32 %v318_v40, %v72_v27 }
  0xdb   :  { %3186 = vst [vmem:[#allocation21_spill] sm:$0xff] %v2895_v6 }
  0xdc   :  { %3187 = vst [vmem:[#allocation22_spill] sm:$0xff] %v2898_v18 }
  0xdd   :  { %3188 = vst [vmem:[#allocation23_spill] sm:$0xff] %v2901_v30 }
  0xde   :  { %3189 = vst [vmem:[#allocation24_spill] sm:$0xff] %v2903_v46 }
  0xe0   :  { %v347_v55 = vpop.f32.mrf.mxu2  ;;  %v619_v6 = vpop.f32.mrf.mxu0 }
  0xe1   :  { %v2907_v63 = vadd.f32 %v347_v55, %v2833_v36  ;;  %v376_v62 = vpop.f32.mrf.mxu3  ;;  %v662_v12 = vadd.f32 %v619_v6, %v273_v45  ;;  %v632_v18 = vpop.f32.mrf.mxu1 }
  0xe2   :  { %v2910_v16 = vadd.f32 %v376_v62, %v2837_v39  ;;  %v663_v24 = vadd.f32 %v632_v18, %v302_v57 }
  0xe3   :  { %3190 = vst [vmem:[#allocation25_spill] sm:$0xff] %v2907_v63  ;;  %v1968_v17 = vmul.f32 -1.442695, %v662_v12 }
  0xe4   :  { %3191 = vst [vmem:[#allocation26_spill] sm:$0xff] %v2910_v16  ;;  %v1969_v30 = vmul.f32 -1.442695, %v663_v24 }
  0xe5   :  { %2102 = vpow2.f32 %v1968_v17 }
  0xe6   :  { %2104 = vpow2.f32 %v1969_v30  ;;  %v331_v30 = vadd.f32 %v2825_v25, %v2833_v36 }
  0xe8   :  { %v645_v40 = vpop.f32.mrf.mxu2  ;;  %v621_v27 = vpop.f32.mrf.mxu0 }
  0xe9   :  { %v658_v23 = vpop.f32.mrf.mxu3  ;;  %v634_v63 = vpop.f32.mrf.mxu1  ;;  %v664_v39 = vadd.f32 %v645_v40, %v331_v30 }
  0xea   :  { %v665_v55 = vadd.f32 %v658_v23, %v360_v19 }
  0xeb   :  { %v2103_v46 = vpop.eup %2102 }
  0xec   :  { %v1970_v11 = vmul.f32 -1.442695, %v665_v55  ;;  %v2105_v5 = vpop.eup %2104  ;;  %v669_v62 = vadd.f32 1.0, %v2103_v46 }
  0xed   :  { %v688_v16 = vadd.f32 1.0, %v2105_v5 }
  0xee   :  { %2106 = vpow2.f32 %v1970_v11  ;;  %v681_v46 = vand.u32 2147483648, %v669_v62  ;;  %v679_v23 = vand.u32 2147483647, %v669_v62  ;;  %vm675_vm2 = vweird.f32 %v669_v62 }
  0xef   :  { %2108 = vrcp.f32 %v669_v62  ;;  %v700_v5 = vand.u32 2147483648, %v688_v16  ;;  %v698_v55 = vand.u32 2147483647, %v688_v16  ;;  %vm694_vm3 = vweird.f32 %v688_v16 }
  0xf0   :  { %2110 = vrcp.f32 %v688_v16  ;;  %v647_v6 = vpop.f32.mrf.mxu2  ;;  %v682_v40 = vor.u32 1.1754944e-38, %v681_v46  ;;  %vm680_vm5 = vcmp.eq.f32.partialorder %v679_v23, 8.507059e+37 }
  0xf1   :  { %v660_v24 = vpop.f32.mrf.mxu3  ;;  %vm699_vm7 = vcmp.eq.f32.partialorder %v698_v55, 8.507059e+37 }
  0xf2   :  { %v701_v24 = vor.u32 1.1754944e-38, %v700_v5 }
  0xf4   :  { %v2107_v18 = vpop.eup %2106 }
  0xf5   :  { %v2109_v28 = vpop.eup %2108  ;;  %v708_v45 = vadd.f32 1.0, %v2107_v18 }
  0xf6   :  { %v2111_v57 = vpop.eup %2110  ;;  %v671_v12 = vmul.f32 %v2109_v28, %v669_v62  ;;  %vm676_vm0 = vweird.f32 %v2109_v28 }
  0xf7   :  { %v690_v63 = vmul.f32 %v2111_v57, %v688_v16  ;;  %2112 = vrcp.f32 %v708_v45  ;;  %vm695_vm1 = vweird.f32 %v2111_v57  ;;  %vm677_vm4 = vmor %vm675_vm2, %vm676_vm0  ;;  %v720_v46 = vand.u32 2147483648, %v708_v45 }
  0xf8   :  { %v672_v17 = vsub.f32 1.0, %v671_v12  ;;  %2114 = vtanh.f32 %v664_v39  ;;  %vm696_vm6 = vmor %vm694_vm3, %vm695_vm1  ;;  %vm714_vm9 = vweird.f32 %v708_v45 }
  0xf9   :  { %v691_v19 = vsub.f32 1.0, %v690_v63  ;;  %v721_v23 = vor.u32 1.1754944e-38, %v720_v46 }
  0xfa   :  { %v673_v11 = vmul.f32 %v2109_v28, %v672_v17 }
  0xfb   :  { %v692_v27 = vmul.f32 %v2111_v57, %v691_v19 }
  0xfc   :  { %v674_v25 = vadd.f32 %v2109_v28, %v673_v11 }
  0xfd   :  { %v2113_v36 = vpop.eup %2112  ;;  %v693_v6 = vadd.f32 %v2111_v57, %v692_v27 }
  0xfe   :  { %v678_v30 = vsel %vm677_vm4, %v2109_v28, %v674_v25  ;;  %v710_v18 = vmul.f32 %v2113_v36, %v708_v45  ;;  %v2115_v39 = vpop.eup %2114  ;;  %vm715_vm8 = vweird.f32 %v2113_v36  ;;  %v718_v28 = vand.u32 2147483647, %v708_v45 }
  0xff   :  { %v683_v12 = vsel %vm680_vm5, %v682_v40, %v678_v30  ;;  %v697_v63 = vsel %vm696_vm6, %v2111_v57, %v693_v6  ;;  %vm716_vm10 = vmor %vm714_vm9, %vm715_vm8 }
 0x100   :  { %v702_v17 = vsel %vm699_vm7, %v701_v24, %v697_v63  ;;  %v725_v19 = vmul.f32 %v2115_v39, %v683_v12  ;;  %v711_v58 = vsub.f32 1.0, %v710_v18  ;;  %vm719_vm11 = vcmp.eq.f32.partialorder %v718_v28, 8.507059e+37 }
 0x101   :  { %v724_v0 = vmul.f32 0.0, %v702_v17 }
 0x102   :  { %v712_v11 = vmul.f32 %v2113_v36, %v711_v58  ;;  %v275_v58 = vadd.f32 %v2829_v29, %v2835_v38 }
 0x103   :  { %v2916_v62 = vadd.f32 %v725_v19, %v724_v0 }
 0x104   :  { %v713_v16 = vadd.f32 %v2113_v36, %v712_v11 }
 0x105   :  { %2116 = vtanh.f32 %v2916_v62 }
 0x106   :  { %v717_v5 = vsel %vm716_vm10, %v2113_v36, %v713_v16 }
 0x107   :  { %v722_v27 = vsel %vm719_vm11, %v721_v23, %v717_v5 }
 0x10b   :  { %v2117_v57 = vpop.eup %2116 }
 0x10c   :  { %v728_v55 = vmul.f32 %v2117_v57, %v722_v27 }
 0x10e   :  { %v734_v25 = vpack.c.bf16 %v728_v55, %v728_v55 }
 0x110   :  { %743 = vmatmul.bf16.vlgmr.msra.gmra.mxu0 %v734_v25  ;;  %756 = vmatmul.bf16.vlgmr.msra.gmra.mxu1 %v734_v25 }
 0x111   :  { %769 = vmatmul.bf16.vlgmr.msra.gmra.mxu2 %v734_v25  ;;  %782 = vmatmul.bf16.vlgmr.msra.gmra.mxu3 %v734_v25 }
 0x112   :  { %985 = vmatpush.bf16.msra.mxu0 %v2473_v37  ;;  %998 = vmatpush.bf16.msra.mxu1 %v2484_v41 }
 0x113   :  { %1011 = vmatpush.bf16.msra.mxu2 %v2501_v47  ;;  %1024 = vmatpush.bf16.msra.mxu3 %v2504_v48 }
 0x116   :  { %986 = vmatpush.bf16.msra.mxu0 %v2506_v49  ;;  %999 = vmatpush.bf16.msra.mxu1 %v2518_v53 }
 0x117   :  { %1012 = vmatpush.bf16.msra.mxu2 %v2536_v59  ;;  %1025 = vmatpush.bf16.msra.mxu3 %v2540_v60 }
 0x11a   :  { %987 = vmatpush.bf16.msra.mxu0 %v2542_v61  ;;  %1000 = vmatpush.bf16.msra.mxu1 %v2554_v1 }
 0x11b   :  { %1013 = vmatpush.bf16.msra.mxu2 %v2572_v7  ;;  %1026 = vmatpush.bf16.msra.mxu3 %v2576_v8 }
 0x11e   :  { %988 = vmatpush.bf16.msra.mxu0 %v2578_v9  ;;  %1001 = vmatpush.bf16.msra.mxu1 %v2590_v13 }
 0x11f   :  { %1014 = vmatpush.bf16.msra.mxu2 %v2611_v20  ;;  %1027 = vmatpush.bf16.msra.mxu3 %v2615_v21 }
 0x122   :  { %989 = vmatpush.bf16.msra.mxu0 %v2617_v22  ;;  %1002 = vmatpush.bf16.msra.mxu1 %v2629_v26 }
 0x123   :  { %1015 = vmatpush.bf16.msra.mxu2 %v2647_v32  ;;  %1028 = vmatpush.bf16.msra.mxu3 %v2651_v33 }
 0x126   :  { %990 = vmatpush.bf16.msra.mxu0 %v2653_v34  ;;  %1003 = vmatpush.bf16.msra.mxu1 %v2656_v35 }
 0x127   :  { %1016 = vmatpush.bf16.msra.mxu2 %v2692_v52  ;;  %1029 = vmatpush.bf16.msra.mxu3 %v2676_v43 }
 0x12a   :  { %991 = vmatpush.bf16.msra.mxu0 %v2678_v44  ;;  %1004 = vmatpush.bf16.msra.mxu1 %v2690_v51 }
 0x12b   :  { %1017 = vmatpush.bf16.msra.mxu2 %v2725_v4  ;;  %1030 = vmatpush.bf16.msra.mxu3 %v2721_v2 }
 0x12e   :  { %992 = vmatpush.bf16.msra.mxu0 %v2723_v3  ;;  %1005 = vmatpush.bf16.msra.mxu1 %v2734_v10 }
 0x12f   :  { %1018 = vmatpush.bf16.msra.mxu2 %v2743_v14  ;;  %1031 = vmatpush.bf16.msra.mxu3 %v2747_v15 }
 0x18d   :  { %v744_v0 = vpop.f32.mrf.mxu0  ;;  %v757_v45 = vpop.f32.mrf.mxu1 }
 0x18e   :  { %v787_v36 = vadd.f32 %v744_v0, %v275_v58  ;;  %v788_v40 = vadd.f32 %v757_v45, %v2831_v31 }
 0x190   :  { %v1971_v6 = vmul.f32 -1.442695, %v787_v36  ;;  %v1972_v24 = vmul.f32 -1.442695, %v788_v40 }
 0x192   :  { %2118 = vpow2.f32 %v1971_v6 }
 0x193   :  { %2120 = vpow2.f32 %v1972_v24 }
 0x194   :  { %v770_v30 = vpop.f32.mrf.mxu2  ;;  %v783_v18 = vpop.f32.mrf.mxu3 }
 0x195   :  { %v790_v39 = vadd.f32 %v783_v18, %v2843_v50  ;;  %v746_v12 = vpop.f32.mrf.mxu0  ;;  %v759_v63 = vpop.f32.mrf.mxu1  ;;  %v789_v23 = vadd.f32 %v770_v30, %v2840_v42 }
 0x197   :  { %v1973_v17 = vmul.f32 -1.442695, %v790_v39 }
 0x198   :  { %v2119_v19 = vpop.eup %2118 }
 0x199   :  { %v2121_v11 = vpop.eup %2120  ;;  %v794_v16 = vadd.f32 1.0, %v2119_v19  ;;  %2122 = vpow2.f32 %v1973_v17 }
 0x19a   :  { %v813_v29 = vadd.f32 1.0, %v2121_v11 }
 0x19b   :  { %2124 = vrcp.f32 %v794_v16  ;;  %v806_v58 = vand.u32 2147483648, %v794_v16  ;;  %v804_v36 = vand.u32 2147483647, %v794_v16  ;;  %vm800_vm14 = vweird.f32 %v794_v16 }
 0x19c   :  { %2126 = vrcp.f32 %v813_v29  ;;  %v772_v38 = vpop.f32.mrf.mxu2  ;;  %v785_v31 = vpop.f32.mrf.mxu3  ;;  %v825_v0 = vand.u32 2147483648, %v813_v29  ;;  %v823_v6 = vand.u32 2147483647, %v813_v29  ;;  %vm819_vm15 = vweird.f32 %v813_v29 }
 0x19d   :  { %v807_v42 = vor.u32 1.1754944e-38, %v806_v58  ;;  %vm805_vm2 = vcmp.eq.f32.partialorder %v804_v36, 8.507059e+37 }
 0x19e   :  { %v826_v12 = vor.u32 1.1754944e-38, %v825_v0  ;;  %vm824_vm3 = vcmp.eq.f32.partialorder %v823_v6, 8.507059e+37 }
 0x19f   :  { %v2123_v46 = vpop.eup %2122 }
 0x1a0   :  { %v833_v28 = vadd.f32 1.0, %v2123_v46 }
 0x1a1   :  { %v2125_v5 = vpop.eup %2124 }
 0x1a2   :  { %v2127_v57 = vpop.eup %2126  ;;  %v796_v27 = vmul.f32 %v2125_v5, %v794_v16  ;;  %2128 = vrcp.f32 %v833_v28  ;;  %vm801_vm12 = vweird.f32 %v2125_v5  ;;  %vm839_vm5 = vweird.f32 %v833_v28 }
 0x1a3   :  { %v815_v50 = vmul.f32 %v2127_v57, %v813_v29  ;;  %2130 = vtanh.f32 %v789_v23  ;;  %vm820_vm13 = vweird.f32 %v2127_v57  ;;  %vm802_vm0 = vmor %vm800_vm14, %vm801_vm12 }
 0x1a4   :  { %v797_v55 = vsub.f32 1.0, %v796_v27  ;;  %vm821_vm1 = vmor %vm819_vm15, %vm820_vm13 }
 0x1a5   :  { %v816_v25 = vsub.f32 1.0, %v815_v50  ;;  %v845_v50 = vand.u32 2147483648, %v833_v28 }
 0x1a6   :  { %v798_v45 = vmul.f32 %v2125_v5, %v797_v55 }
 0x1a7   :  { %v817_v40 = vmul.f32 %v2127_v57, %v816_v25  ;;  %v846_v25 = vor.u32 1.1754944e-38, %v845_v50 }
 0x1a8   :  { %v2129_v24 = vpop.eup %2128  ;;  %v799_v18 = vadd.f32 %v2125_v5, %v798_v45 }
 0x1a9   :  { %v818_v30 = vadd.f32 %v2127_v57, %v817_v40  ;;  %v835_v39 = vmul.f32 %v2129_v24, %v833_v28  ;;  %v2131_v17 = vpop.eup %2130  ;;  %vm840_vm4 = vweird.f32 %v2129_v24 }
 0x1aa   :  { %v803_v63 = vsel %vm802_vm0, %v2125_v5, %v799_v18  ;;  %v843_v5 = vand.u32 2147483647, %v833_v28  ;;  %vm841_vm6 = vmor %vm839_vm5, %vm840_vm4 }
 0x1ab   :  { %v808_v19 = vsel %vm805_vm2, %v807_v42, %v803_v63  ;;  %v822_v11 = vsel %vm821_vm1, %v2127_v57, %v818_v30  ;;  %v836_v38 = vsub.f32 1.0, %v835_v39  ;;  %v3192_v30 = vld [vmem:[#allocation6_spill] sm:$0xff] }
 0x1ac   :  { %v827_v31 = vsel %vm824_vm3, %v826_v12, %v822_v11  ;;  %v850_v46 = vmul.f32 %v2131_v17, %v808_v19  ;;  %vm844_vm7 = vcmp.eq.f32.partialorder %v843_v5, 8.507059e+37 }
 0x1ad   :  { %v849_v23 = vmul.f32 %v827_v31, %v2916_v62  ;;  %v837_v27 = vmul.f32 %v2129_v24, %v836_v38 }
 0x1af   :  { %v2957_v16 = vadd.f32 %v850_v46, %v849_v23  ;;  %v838_v29 = vadd.f32 %v2129_v24, %v837_v27 }
 0x1b1   :  { %2132 = vtanh.f32 %v2957_v16  ;;  %v842_v55 = vsel %vm841_vm6, %v2129_v24, %v838_v29  ;;  %v3193_v29 = vld [vmem:[#allocation5_spill] sm:$0xff] }
 0x1b2   :  { %v847_v58 = vsel %vm844_vm7, %v846_v25, %v842_v55 }
 0x1b7   :  { %v2133_v57 = vpop.eup %2132 }
 0x1b8   :  { %v853_v0 = vmul.f32 %v2133_v57, %v847_v58 }
 0x1ba   :  { %v859_v45 = vpack.c.bf16 %v853_v0, %v853_v0 }
 0x1bc   :  { %868 = vmatmul.bf16.vlgmr.msrb.gmra.mxu0 %v859_v45  ;;  %881 = vmatmul.bf16.vlgmr.msrb.gmra.mxu1 %v859_v45 }
 0x1bd   :  { %894 = vmatmul.bf16.vlgmr.msrb.gmra.mxu2 %v859_v45  ;;  %907 = vmatmul.bf16.vlgmr.msrb.gmra.mxu3 %v859_v45 }
 0x1be   :  { %1110 = vmatpush.bf16.msrb.mxu0 %v2473_v37  ;;  %1123 = vmatpush.bf16.msrb.mxu1 %v2484_v41 }
 0x1bf   :  { %1136 = vmatpush.bf16.msrb.mxu2 %v2501_v47  ;;  %1149 = vmatpush.bf16.msrb.mxu3 %v2504_v48 }
 0x1c2   :  { %1111 = vmatpush.bf16.msrb.mxu0 %v2506_v49  ;;  %1124 = vmatpush.bf16.msrb.mxu1 %v2518_v53 }
 0x1c3   :  { %1137 = vmatpush.bf16.msrb.mxu2 %v2536_v59  ;;  %1150 = vmatpush.bf16.msrb.mxu3 %v2540_v60 }
 0x1c6   :  { %1112 = vmatpush.bf16.msrb.mxu0 %v2542_v61  ;;  %1125 = vmatpush.bf16.msrb.mxu1 %v2554_v1 }
 0x1c7   :  { %1138 = vmatpush.bf16.msrb.mxu2 %v2572_v7  ;;  %1151 = vmatpush.bf16.msrb.mxu3 %v2576_v8 }
 0x1ca   :  { %1113 = vmatpush.bf16.msrb.mxu0 %v2578_v9  ;;  %1126 = vmatpush.bf16.msrb.mxu1 %v2590_v13 }
 0x1cb   :  { %1139 = vmatpush.bf16.msrb.mxu2 %v2611_v20  ;;  %1152 = vmatpush.bf16.msrb.mxu3 %v2615_v21 }
 0x1ce   :  { %1114 = vmatpush.bf16.msrb.mxu0 %v2617_v22  ;;  %1127 = vmatpush.bf16.msrb.mxu1 %v2629_v26 }
 0x1cf   :  { %1140 = vmatpush.bf16.msrb.mxu2 %v2647_v32  ;;  %1153 = vmatpush.bf16.msrb.mxu3 %v2651_v33 }
 0x1d2   :  { %1115 = vmatpush.bf16.msrb.mxu0 %v2653_v34  ;;  %1128 = vmatpush.bf16.msrb.mxu1 %v2656_v35 }
 0x1d3   :  { %1141 = vmatpush.bf16.msrb.mxu2 %v2692_v52  ;;  %1154 = vmatpush.bf16.msrb.mxu3 %v2676_v43 }
 0x1d6   :  { %1116 = vmatpush.bf16.msrb.mxu0 %v2678_v44  ;;  %1129 = vmatpush.bf16.msrb.mxu1 %v2690_v51 }
 0x1d7   :  { %1142 = vmatpush.bf16.msrb.mxu2 %v2725_v4  ;;  %1155 = vmatpush.bf16.msrb.mxu3 %v2721_v2 }
 0x1da   :  { %1117 = vmatpush.bf16.msrb.mxu0 %v2723_v3  ;;  %1130 = vmatpush.bf16.msrb.mxu1 %v2734_v10 }
 0x1db   :  { %1143 = vmatpush.bf16.msrb.mxu2 %v2743_v14  ;;  %1156 = vmatpush.bf16.msrb.mxu3 %v2747_v15 }
 0x239   :  { %v869_v62 = vpop.f32.mrf.mxu0  ;;  %v882_v28 = vpop.f32.mrf.mxu1 }
 0x23a   :  { %v912_v36 = vadd.f32 %v869_v62, %v2846_v54  ;;  %v913_v40 = vadd.f32 %v882_v28, %v2848_v56 }
 0x23c   :  { %v1974_v6 = vmul.f32 -1.442695, %v912_v36  ;;  %v1975_v24 = vmul.f32 -1.442695, %v913_v40 }
 0x23e   :  { %2134 = vpow2.f32 %v1974_v6 }
 0x23f   :  { %2136 = vpow2.f32 %v1975_v24 }
 0x240   :  { %v895_v18 = vpop.f32.mrf.mxu2  ;;  %v908_v42 = vpop.f32.mrf.mxu3 }
 0x241   :  { %v915_v39 = vadd.f32 %v908_v42, %v3192_v30  ;;  %v871_v12 = vpop.f32.mrf.mxu0  ;;  %v884_v63 = vpop.f32.mrf.mxu1  ;;  %v914_v50 = vadd.f32 %v895_v18, %v3193_v29 }
 0x243   :  { %v1976_v17 = vmul.f32 -1.442695, %v915_v39 }
 0x244   :  { %v2135_v19 = vpop.eup %2134 }
 0x245   :  { %v2137_v11 = vpop.eup %2136  ;;  %v919_v38 = vadd.f32 1.0, %v2135_v19  ;;  %2138 = vpow2.f32 %v1976_v17 }
 0x246   :  { %v938_v31 = vadd.f32 1.0, %v2137_v11 }
 0x247   :  { %2140 = vrcp.f32 %v919_v38  ;;  %v931_v0 = vand.u32 2147483648, %v919_v38  ;;  %v929_v28 = vand.u32 2147483647, %v919_v38  ;;  %vm925_vm10 = vweird.f32 %v919_v38 }
 0x248   :  { %2142 = vrcp.f32 %v938_v31  ;;  %v897_v54 = vpop.f32.mrf.mxu2  ;;  %v910_v56 = vpop.f32.mrf.mxu3  ;;  %v950_v45 = vand.u32 2147483648, %v938_v31  ;;  %v948_v40 = vand.u32 2147483647, %v938_v31  ;;  %vm944_vm11 = vweird.f32 %v938_v31 }
 0x249   :  { %v932_v18 = vor.u32 1.1754944e-38, %v931_v0  ;;  %vm930_vm14 = vcmp.eq.f32.partialorder %v929_v28, 8.507059e+37  ;;  %v3195_v28 = vld [vmem:[#allocation8_spill] sm:$0xff] }
 0x24a   :  { %v951_v39 = vor.u32 1.1754944e-38, %v950_v45  ;;  %vm949_vm15 = vcmp.eq.f32.partialorder %v948_v40, 8.507059e+37  ;;  %v3194_v45 = vld [vmem:[#allocation7_spill] sm:$0xff] }
 0x24b   :  { %v2139_v46 = vpop.eup %2138 }
 0x24c   :  { %v958_v23 = vadd.f32 1.0, %v2139_v46 }
 0x24d   :  { %v2141_v27 = vpop.eup %2140 }
 0x24e   :  { %v2143_v5 = vpop.eup %2142  ;;  %v921_v55 = vmul.f32 %v2141_v27, %v919_v38  ;;  %2144 = vrcp.f32 %v958_v23  ;;  %vm926_vm8 = vweird.f32 %v2141_v27  ;;  %vm964_vm1 = vweird.f32 %v958_v23 }
 0x24f   :  { %v940_v25 = vmul.f32 %v2143_v5, %v938_v31  ;;  %2146 = vtanh.f32 %v914_v50  ;;  %vm945_vm9 = vweird.f32 %v2143_v5  ;;  %vm927_vm12 = vmor %vm925_vm10, %vm926_vm8  ;;  %v970_v50 = vand.u32 2147483648, %v958_v23 }
 0x250   :  { %v922_v57 = vsub.f32 1.0, %v921_v55  ;;  %vm946_vm13 = vmor %vm944_vm11, %vm945_vm9 }
 0x251   :  { %v941_v58 = vsub.f32 1.0, %v940_v25  ;;  %v971_v25 = vor.u32 1.1754944e-38, %v970_v50 }
 0x252   :  { %v923_v62 = vmul.f32 %v2141_v27, %v922_v57 }
 0x253   :  { %v942_v36 = vmul.f32 %v2143_v5, %v941_v58 }
 0x254   :  { %v2145_v6 = vpop.eup %2144  ;;  %v924_v24 = vadd.f32 %v2141_v27, %v923_v62 }
 0x255   :  { %v943_v42 = vadd.f32 %v2143_v5, %v942_v36  ;;  %v960_v30 = vmul.f32 %v2145_v6, %v958_v23  ;;  %v2147_v63 = vpop.eup %2146  ;;  %vm965_vm0 = vweird.f32 %v2145_v6 }
 0x256   :  { %v928_v12 = vsel %vm927_vm12, %v2141_v27, %v924_v24  ;;  %v968_v27 = vand.u32 2147483647, %v958_v23  ;;  %vm966_vm2 = vmor %vm964_vm1, %vm965_vm0 }
 0x257   :  { %v933_v17 = vsel %vm930_vm14, %v932_v18, %v928_v12  ;;  %v947_v19 = vsel %vm946_vm13, %v2143_v5, %v943_v42  ;;  %v961_v11 = vsub.f32 1.0, %v960_v30  ;;  %v3196_v42 = vld [vmem:[#allocation10_spill] sm:$0xff] }
 0x258   :  { %v952_v54 = vsel %vm949_vm15, %v951_v39, %v947_v19  ;;  %v975_v56 = vmul.f32 %v2147_v63, %v933_v17  ;;  %vm969_vm3 = vcmp.eq.f32.partialorder %v968_v27, 8.507059e+37  ;;  %v3197_v27 = vld [vmem:[#allocation9_spill] sm:$0xff] }
 0x259   :  { %v974_v46 = vmul.f32 %v952_v54, %v2957_v16  ;;  %v962_v29 = vmul.f32 %v2145_v6, %v961_v11 }
 0x25b   :  { %v2997_v38 = vadd.f32 %v975_v56, %v974_v46  ;;  %v963_v31 = vadd.f32 %v2145_v6, %v962_v29 }
 0x25d   :  { %2148 = vtanh.f32 %v2997_v38  ;;  %v967_v55 = vsel %vm966_vm2, %v2145_v6, %v963_v31 }
 0x25e   :  { %v972_v57 = vsel %vm969_vm3, %v971_v25, %v967_v55 }
 0x263   :  { %v2149_v5 = vpop.eup %2148 }
 0x264   :  { %v978_v58 = vmul.f32 %v2149_v5, %v972_v57 }
 0x266   :  { %v984_v0 = vpack.c.bf16 %v978_v58, %v978_v58 }
 0x268   :  { %993 = vmatmul.bf16.vlgmr.msra.gmra.mxu0 %v984_v0  ;;  %1006 = vmatmul.bf16.vlgmr.msra.gmra.mxu1 %v984_v0 }
 0x269   :  { %1019 = vmatmul.bf16.vlgmr.msra.gmra.mxu2 %v984_v0  ;;  %1032 = vmatmul.bf16.vlgmr.msra.gmra.mxu3 %v984_v0 }
 0x26a   :  { %1235 = vmatpush.bf16.msra.mxu0 %v2473_v37  ;;  %1248 = vmatpush.bf16.msra.mxu1 %v2484_v41 }
 0x26b   :  { %1261 = vmatpush.bf16.msra.mxu2 %v2501_v47  ;;  %1274 = vmatpush.bf16.msra.mxu3 %v2504_v48 }
 0x26e   :  { %1236 = vmatpush.bf16.msra.mxu0 %v2506_v49  ;;  %1249 = vmatpush.bf16.msra.mxu1 %v2518_v53 }
 0x26f   :  { %1262 = vmatpush.bf16.msra.mxu2 %v2536_v59  ;;  %1275 = vmatpush.bf16.msra.mxu3 %v2540_v60 }
 0x272   :  { %1237 = vmatpush.bf16.msra.mxu0 %v2542_v61  ;;  %1250 = vmatpush.bf16.msra.mxu1 %v2554_v1 }
 0x273   :  { %1263 = vmatpush.bf16.msra.mxu2 %v2572_v7  ;;  %1276 = vmatpush.bf16.msra.mxu3 %v2576_v8 }
 0x276   :  { %1238 = vmatpush.bf16.msra.mxu0 %v2578_v9  ;;  %1251 = vmatpush.bf16.msra.mxu1 %v2590_v13 }
 0x277   :  { %1264 = vmatpush.bf16.msra.mxu2 %v2611_v20  ;;  %1277 = vmatpush.bf16.msra.mxu3 %v2615_v21 }
 0x27a   :  { %1239 = vmatpush.bf16.msra.mxu0 %v2617_v22  ;;  %1252 = vmatpush.bf16.msra.mxu1 %v2629_v26 }
 0x27b   :  { %1265 = vmatpush.bf16.msra.mxu2 %v2647_v32  ;;  %1278 = vmatpush.bf16.msra.mxu3 %v2651_v33 }
 0x27e   :  { %1240 = vmatpush.bf16.msra.mxu0 %v2653_v34  ;;  %1253 = vmatpush.bf16.msra.mxu1 %v2656_v35 }
 0x27f   :  { %1266 = vmatpush.bf16.msra.mxu2 %v2692_v52  ;;  %1279 = vmatpush.bf16.msra.mxu3 %v2676_v43 }
 0x282   :  { %1241 = vmatpush.bf16.msra.mxu0 %v2678_v44  ;;  %1254 = vmatpush.bf16.msra.mxu1 %v2690_v51 }
 0x283   :  { %1267 = vmatpush.bf16.msra.mxu2 %v2725_v4  ;;  %1280 = vmatpush.bf16.msra.mxu3 %v2721_v2 }
 0x286   :  { %1242 = vmatpush.bf16.msra.mxu0 %v2723_v3  ;;  %1255 = vmatpush.bf16.msra.mxu1 %v2734_v10 }
 0x287   :  { %1268 = vmatpush.bf16.msra.mxu2 %v2743_v14  ;;  %1281 = vmatpush.bf16.msra.mxu3 %v2747_v15 }
 0x2e5   :  { %v994_v16 = vpop.f32.mrf.mxu0  ;;  %v1007_v23 = vpop.f32.mrf.mxu1 }
 0x2e6   :  { %v1037_v62 = vadd.f32 %v994_v16, %v3194_v45  ;;  %v1038_v36 = vadd.f32 %v1007_v23, %v3195_v28 }
 0x2e8   :  { %v1977_v40 = vmul.f32 -1.442695, %v1037_v62  ;;  %v1978_v6 = vmul.f32 -1.442695, %v1038_v36 }
 0x2ea   :  { %2150 = vpow2.f32 %v1977_v40 }
 0x2eb   :  { %2152 = vpow2.f32 %v1978_v6 }
 0x2ec   :  { %v1020_v24 = vpop.f32.mrf.mxu2  ;;  %v1033_v18 = vpop.f32.mrf.mxu3 }
 0x2ed   :  { %v1040_v30 = vadd.f32 %v1033_v18, %v3196_v42  ;;  %v996_v39 = vpop.f32.mrf.mxu0  ;;  %v1009_v12 = vpop.f32.mrf.mxu1  ;;  %v1039_v55 = vadd.f32 %v1020_v24, %v3197_v27 }
 0x2ef   :  { %v1979_v63 = vmul.f32 -1.442695, %v1040_v30 }
 0x2f0   :  { %v2151_v17 = vpop.eup %2150 }
 0x2f1   :  { %v2153_v19 = vpop.eup %2152  ;;  %v1044_v11 = vadd.f32 1.0, %v2151_v17  ;;  %2154 = vpow2.f32 %v1979_v63 }
 0x2f2   :  { %v1063_v54 = vadd.f32 1.0, %v2153_v19 }
 0x2f3   :  { %2156 = vrcp.f32 %v1044_v11  ;;  %v1056_v16 = vand.u32 2147483648, %v1044_v11  ;;  %v1054_v62 = vand.u32 2147483647, %v1044_v11  ;;  %vm1050_vm6 = vweird.f32 %v1044_v11 }
 0x2f4   :  { %2158 = vrcp.f32 %v1063_v54  ;;  %v1022_v56 = vpop.f32.mrf.mxu2  ;;  %v1035_v46 = vpop.f32.mrf.mxu3  ;;  %v1075_v23 = vand.u32 2147483648, %v1063_v54  ;;  %v1073_v36 = vand.u32 2147483647, %v1063_v54  ;;  %vm1069_vm7 = vweird.f32 %v1063_v54 }
 0x2f5   :  { %v1057_v24 = vor.u32 1.1754944e-38, %v1056_v16  ;;  %vm1055_vm10 = vcmp.eq.f32.partialorder %v1054_v62, 8.507059e+37  ;;  %v3199_v62 = vld [vmem:[#allocation12_spill] sm:$0xff] }
 0x2f6   :  { %v1076_v30 = vor.u32 1.1754944e-38, %v1075_v23  ;;  %vm1074_vm11 = vcmp.eq.f32.partialorder %v1073_v36, 8.507059e+37  ;;  %v3198_v23 = vld [vmem:[#allocation11_spill] sm:$0xff] }
 0x2f7   :  { %v2155_v29 = vpop.eup %2154 }
 0x2f8   :  { %v1083_v31 = vadd.f32 1.0, %v2155_v29 }
 0x2f9   :  { %v2157_v50 = vpop.eup %2156 }
 0x2fa   :  { %v2159_v25 = vpop.eup %2158  ;;  %v1046_v5 = vmul.f32 %v2157_v50, %v1044_v11  ;;  %2160 = vrcp.f32 %v1083_v31  ;;  %vm1051_vm4 = vweird.f32 %v2157_v50  ;;  %vm1089_vm13 = vweird.f32 %v1083_v31 }
 0x2fb   :  { %v1065_v57 = vmul.f32 %v2159_v25, %v1063_v54  ;;  %2162 = vtanh.f32 %v1039_v55  ;;  %vm1070_vm5 = vweird.f32 %v2159_v25  ;;  %vm1052_vm8 = vmor %vm1050_vm6, %vm1051_vm4  ;;  %v1095_v55 = vand.u32 2147483648, %v1083_v31 }
 0x2fc   :  { %v1047_v58 = vsub.f32 1.0, %v1046_v5  ;;  %vm1071_vm9 = vmor %vm1069_vm7, %vm1070_vm5 }
 0x2fd   :  { %v1066_v0 = vsub.f32 1.0, %v1065_v57  ;;  %v1096_v57 = vor.u32 1.1754944e-38, %v1095_v55 }
 0x2fe   :  { %v1048_v45 = vmul.f32 %v2157_v50, %v1047_v58 }
 0x2ff   :  { %v1067_v28 = vmul.f32 %v2159_v25, %v1066_v0 }
 0x300   :  { %v2161_v40 = vpop.eup %2160  ;;  %v1049_v6 = vadd.f32 %v2157_v50, %v1048_v45 }
 0x301   :  { %v1068_v18 = vadd.f32 %v2159_v25, %v1067_v28  ;;  %v1085_v42 = vmul.f32 %v2161_v40, %v1083_v31  ;;  %v2163_v12 = vpop.eup %2162  ;;  %vm1090_vm12 = vweird.f32 %v2161_v40 }
 0x302   :  { %v1053_v39 = vsel %vm1052_vm8, %v2157_v50, %v1049_v6  ;;  %v1093_v50 = vand.u32 2147483647, %v1083_v31  ;;  %vm1091_vm14 = vmor %vm1089_vm13, %vm1090_vm12 }
 0x303   :  { %v1058_v63 = vsel %vm1055_vm10, %v1057_v24, %v1053_v39  ;;  %v1072_v17 = vsel %vm1071_vm9, %v2159_v25, %v1068_v18  ;;  %v1086_v19 = vsub.f32 1.0, %v1085_v42  ;;  %v3200_v18 = vld [vmem:[#allocation14_spill] sm:$0xff] }
 0x304   :  { %v1077_v56 = vsel %vm1074_vm11, %v1076_v30, %v1072_v17  ;;  %v1100_v46 = vmul.f32 %v2163_v12, %v1058_v63  ;;  %vm1094_vm15 = vcmp.eq.f32.partialorder %v1093_v50, 8.507059e+37  ;;  %v3201_v50 = vld [vmem:[#allocation13_spill] sm:$0xff] }
 0x305   :  { %v1099_v29 = vmul.f32 %v1077_v56, %v2997_v38  ;;  %v1087_v27 = vmul.f32 %v2161_v40, %v1086_v19 }
 0x307   :  { %v3037_v11 = vadd.f32 %v1100_v46, %v1099_v29  ;;  %v1088_v54 = vadd.f32 %v2161_v40, %v1087_v27 }
 0x309   :  { %2164 = vtanh.f32 %v3037_v11  ;;  %v1092_v5 = vsel %vm1091_vm14, %v2161_v40, %v1088_v54 }
 0x30a   :  { %v1097_v58 = vsel %vm1094_vm15, %v1096_v57, %v1092_v5 }
 0x30f   :  { %v2165_v25 = vpop.eup %2164 }
 0x310   :  { %v1103_v0 = vmul.f32 %v2165_v25, %v1097_v58 }
 0x312   :  { %v1109_v16 = vpack.c.bf16 %v1103_v0, %v1103_v0 }
 0x314   :  { %1118 = vmatmul.bf16.vlgmr.msrb.gmra.mxu0 %v1109_v16  ;;  %1131 = vmatmul.bf16.vlgmr.msrb.gmra.mxu1 %v1109_v16 }
 0x315   :  { %1144 = vmatmul.bf16.vlgmr.msrb.gmra.mxu2 %v1109_v16  ;;  %1157 = vmatmul.bf16.vlgmr.msrb.gmra.mxu3 %v1109_v16 }
 0x316   :  { %1360 = vmatpush.bf16.msrb.mxu0 %v2473_v37  ;;  %1373 = vmatpush.bf16.msrb.mxu1 %v2484_v41 }
 0x317   :  { %1386 = vmatpush.bf16.msrb.mxu2 %v2501_v47  ;;  %1399 = vmatpush.bf16.msrb.mxu3 %v2504_v48 }
 0x31a   :  { %1361 = vmatpush.bf16.msrb.mxu0 %v2506_v49  ;;  %1374 = vmatpush.bf16.msrb.mxu1 %v2518_v53 }
 0x31b   :  { %1387 = vmatpush.bf16.msrb.mxu2 %v2536_v59  ;;  %1400 = vmatpush.bf16.msrb.mxu3 %v2540_v60 }
 0x31e   :  { %1362 = vmatpush.bf16.msrb.mxu0 %v2542_v61  ;;  %1375 = vmatpush.bf16.msrb.mxu1 %v2554_v1 }
 0x31f   :  { %1388 = vmatpush.bf16.msrb.mxu2 %v2572_v7  ;;  %1401 = vmatpush.bf16.msrb.mxu3 %v2576_v8 }
 0x322   :  { %1363 = vmatpush.bf16.msrb.mxu0 %v2578_v9  ;;  %1376 = vmatpush.bf16.msrb.mxu1 %v2590_v13 }
 0x323   :  { %1389 = vmatpush.bf16.msrb.mxu2 %v2611_v20  ;;  %1402 = vmatpush.bf16.msrb.mxu3 %v2615_v21 }
 0x326   :  { %1364 = vmatpush.bf16.msrb.mxu0 %v2617_v22  ;;  %1377 = vmatpush.bf16.msrb.mxu1 %v2629_v26 }
 0x327   :  { %1390 = vmatpush.bf16.msrb.mxu2 %v2647_v32  ;;  %1403 = vmatpush.bf16.msrb.mxu3 %v2651_v33 }
 0x32a   :  { %1365 = vmatpush.bf16.msrb.mxu0 %v2653_v34  ;;  %1378 = vmatpush.bf16.msrb.mxu1 %v2656_v35 }
 0x32b   :  { %1391 = vmatpush.bf16.msrb.mxu2 %v2692_v52  ;;  %1404 = vmatpush.bf16.msrb.mxu3 %v2676_v43 }
 0x32e   :  { %1366 = vmatpush.bf16.msrb.mxu0 %v2678_v44  ;;  %1379 = vmatpush.bf16.msrb.mxu1 %v2690_v51 }
 0x32f   :  { %1392 = vmatpush.bf16.msrb.mxu2 %v2725_v4  ;;  %1405 = vmatpush.bf16.msrb.mxu3 %v2721_v2 }
 0x332   :  { %1367 = vmatpush.bf16.msrb.mxu0 %v2723_v3  ;;  %1380 = vmatpush.bf16.msrb.mxu1 %v2734_v10 }
 0x333   :  { %1393 = vmatpush.bf16.msrb.mxu2 %v2743_v14  ;;  %1406 = vmatpush.bf16.msrb.mxu3 %v2747_v15 }
 0x391   :  { %v1119_v38 = vpop.f32.mrf.mxu0  ;;  %v1132_v31 = vpop.f32.mrf.mxu1 }
 0x392   :  { %v1162_v45 = vadd.f32 %v1119_v38, %v3198_v23  ;;  %v1163_v28 = vadd.f32 %v1132_v31, %v3199_v62 }
 0x394   :  { %v1980_v36 = vmul.f32 -1.442695, %v1162_v45  ;;  %v1981_v40 = vmul.f32 -1.442695, %v1163_v28 }
 0x396   :  { %2166 = vpow2.f32 %v1980_v36 }
 0x397   :  { %2168 = vpow2.f32 %v1981_v40 }
 0x398   :  { %v1145_v6 = vpop.f32.mrf.mxu2  ;;  %v1158_v24 = vpop.f32.mrf.mxu3 }
 0x399   :  { %v1165_v42 = vadd.f32 %v1158_v24, %v3200_v18  ;;  %v1121_v30 = vpop.f32.mrf.mxu0  ;;  %v1134_v39 = vpop.f32.mrf.mxu1  ;;  %v1164_v5 = vadd.f32 %v1145_v6, %v3201_v50 }
 0x39b   :  { %v1982_v12 = vmul.f32 -1.442695, %v1165_v42 }
 0x39c   :  { %v2167_v63 = vpop.eup %2166 }
 0x39d   :  { %v2169_v17 = vpop.eup %2168  ;;  %v1169_v19 = vadd.f32 1.0, %v2167_v63  ;;  %2170 = vpow2.f32 %v1982_v12 }
 0x39e   :  { %v1188_v56 = vadd.f32 1.0, %v2169_v17 }
 0x39f   :  { %2172 = vrcp.f32 %v1169_v19  ;;  %v1181_v38 = vand.u32 2147483648, %v1169_v19  ;;  %v1179_v45 = vand.u32 2147483647, %v1169_v19  ;;  %vm1175_vm2 = vweird.f32 %v1169_v19 }
 0x3a0   :  { %2174 = vrcp.f32 %v1188_v56  ;;  %v1147_v46 = vpop.f32.mrf.mxu2  ;;  %v1160_v29 = vpop.f32.mrf.mxu3  ;;  %v1200_v31 = vand.u32 2147483648, %v1188_v56  ;;  %v1198_v28 = vand.u32 2147483647, %v1188_v56  ;;  %vm1194_vm3 = vweird.f32 %v1188_v56 }
 0x3a1   :  { %v1182_v6 = vor.u32 1.1754944e-38, %v1181_v38  ;;  %vm1180_vm6 = vcmp.eq.f32.partialorder %v1179_v45, 8.507059e+37 }
 0x3a2   :  { %v1201_v42 = vor.u32 1.1754944e-38, %v1200_v31  ;;  %vm1199_vm7 = vcmp.eq.f32.partialorder %v1198_v28, 8.507059e+37 }
 0x3a3   :  { %v2171_v27 = vpop.eup %2170 }
 0x3a4   :  { %v1208_v54 = vadd.f32 1.0, %v2171_v27 }
 0x3a5   :  { %v2173_v55 = vpop.eup %2172 }
 0x3a6   :  { %v2175_v57 = vpop.eup %2174  ;;  %v1171_v25 = vmul.f32 %v2173_v55, %v1169_v19  ;;  %2176 = vrcp.f32 %v1208_v54  ;;  %vm1176_vm0 = vweird.f32 %v2173_v55  ;;  %vm1214_vm9 = vweird.f32 %v1208_v54 }
 0x3a7   :  { %v1190_v58 = vmul.f32 %v2175_v57, %v1188_v56  ;;  %2178 = vtanh.f32 %v1164_v5  ;;  %vm1195_vm1 = vweird.f32 %v2175_v57  ;;  %vm1177_vm4 = vmor %vm1175_vm2, %vm1176_vm0  ;;  %v1220_v5 = vand.u32 2147483648, %v1208_v54 }
 0x3a8   :  { %v1172_v0 = vsub.f32 1.0, %v1171_v25  ;;  %vm1196_vm5 = vmor %vm1194_vm3, %vm1195_vm1 }
 0x3a9   :  { %v1191_v16 = vsub.f32 1.0, %v1190_v58  ;;  %v1221_v58 = vor.u32 1.1754944e-38, %v1220_v5 }
 0x3aa   :  { %v1173_v23 = vmul.f32 %v2173_v55, %v1172_v0 }
 0x3ab   :  { %v1192_v62 = vmul.f32 %v2175_v57, %v1191_v16 }
 0x3ac   :  { %v2177_v36 = vpop.eup %2176  ;;  %v1174_v40 = vadd.f32 %v2173_v55, %v1173_v23 }
 0x3ad   :  { %v1193_v24 = vadd.f32 %v2175_v57, %v1192_v62  ;;  %v1210_v18 = vmul.f32 %v2177_v36, %v1208_v54  ;;  %v2179_v39 = vpop.eup %2178  ;;  %vm1215_vm8 = vweird.f32 %v2177_v36 }
 0x3ae   :  { %v1178_v30 = vsel %vm1177_vm4, %v2173_v55, %v1174_v40  ;;  %v1218_v55 = vand.u32 2147483647, %v1208_v54  ;;  %vm1216_vm10 = vmor %vm1214_vm9, %vm1215_vm8 }
 0x3af   :  { %v1183_v12 = vsel %vm1180_vm6, %v1182_v6, %v1178_v30  ;;  %v1197_v63 = vsel %vm1196_vm5, %v2175_v57, %v1193_v24  ;;  %v1211_v17 = vsub.f32 1.0, %v1210_v18 }
 0x3b0   :  { %v1202_v46 = vsel %vm1199_vm7, %v1201_v42, %v1197_v63  ;;  %v1225_v29 = vmul.f32 %v2179_v39, %v1183_v12  ;;  %vm1219_vm11 = vcmp.eq.f32.partialorder %v1218_v55, 8.507059e+37 }
 0x3b1   :  { %v1224_v27 = vmul.f32 %v1202_v46, %v3037_v11  ;;  %v1212_v50 = vmul.f32 %v2177_v36, %v1211_v17 }
 0x3b3   :  { %v3077_v19 = vadd.f32 %v1225_v29, %v1224_v27  ;;  %v1213_v56 = vadd.f32 %v2177_v36, %v1212_v50 }
 0x3b5   :  { %2180 = vtanh.f32 %v3077_v19  ;;  %v1217_v25 = vsel %vm1216_vm10, %v2177_v36, %v1213_v56 }
 0x3b6   :  { %v1222_v0 = vsel %vm1219_vm11, %v1221_v58, %v1217_v25 }
 0x3bb   :  { %v2181_v57 = vpop.eup %2180 }
 0x3bc   :  { %v1228_v16 = vmul.f32 %v2181_v57, %v1222_v0 }
 0x3be   :  { %v1234_v38 = vpack.c.bf16 %v1228_v16, %v1228_v16 }
 0x3c0   :  { %1243 = vmatmul.bf16.vlgmr.msra.gmra.mxu0 %v1234_v38  ;;  %1256 = vmatmul.bf16.vlgmr.msra.gmra.mxu1 %v1234_v38 }
 0x3c1   :  { %1269 = vmatmul.bf16.vlgmr.msra.gmra.mxu2 %v1234_v38  ;;  %1282 = vmatmul.bf16.vlgmr.msra.gmra.mxu3 %v1234_v38 }
 0x3c2   :  { %1485 = vmatpush.bf16.msra.mxu0 %v2473_v37  ;;  %1498 = vmatpush.bf16.msra.mxu1 %v2484_v41 }
 0x3c3   :  { %1511 = vmatpush.bf16.msra.mxu2 %v2501_v47  ;;  %1524 = vmatpush.bf16.msra.mxu3 %v2504_v48  ;;  %v3202_v47 = vld [vmem:[#allocation15_spill] sm:$0xff] }
 0x3c6   :  { %1486 = vmatpush.bf16.msra.mxu0 %v2506_v49  ;;  %1499 = vmatpush.bf16.msra.mxu1 %v2518_v53  ;;  %v3203_v49 = vld [vmem:[#allocation16_spill] sm:$0xff] }
 0x3c7   :  { %1512 = vmatpush.bf16.msra.mxu2 %v2536_v59  ;;  %1525 = vmatpush.bf16.msra.mxu3 %v2540_v60 }
 0x3ca   :  { %1487 = vmatpush.bf16.msra.mxu0 %v2542_v61  ;;  %1500 = vmatpush.bf16.msra.mxu1 %v2554_v1 }
 0x3cb   :  { %1513 = vmatpush.bf16.msra.mxu2 %v2572_v7  ;;  %1526 = vmatpush.bf16.msra.mxu3 %v2576_v8  ;;  %v3204_v7 = vld [vmem:[#allocation18_spill] sm:$0xff] }
 0x3ce   :  { %1488 = vmatpush.bf16.msra.mxu0 %v2578_v9  ;;  %1501 = vmatpush.bf16.msra.mxu1 %v2590_v13 }
 0x3cf   :  { %1514 = vmatpush.bf16.msra.mxu2 %v2611_v20  ;;  %1527 = vmatpush.bf16.msra.mxu3 %v2615_v21 }
 0x3d2   :  { %1489 = vmatpush.bf16.msra.mxu0 %v2617_v22  ;;  %1502 = vmatpush.bf16.msra.mxu1 %v2629_v26 }
 0x3d3   :  { %1515 = vmatpush.bf16.msra.mxu2 %v2647_v32  ;;  %1528 = vmatpush.bf16.msra.mxu3 %v2651_v33 }
 0x3d6   :  { %1490 = vmatpush.bf16.msra.mxu0 %v2653_v34  ;;  %1503 = vmatpush.bf16.msra.mxu1 %v2656_v35 }
 0x3d7   :  { %1516 = vmatpush.bf16.msra.mxu2 %v2692_v52  ;;  %1529 = vmatpush.bf16.msra.mxu3 %v2676_v43 }
 0x3da   :  { %1491 = vmatpush.bf16.msra.mxu0 %v2678_v44  ;;  %1504 = vmatpush.bf16.msra.mxu1 %v2690_v51  ;;  %v3205_v51 = vld [vmem:[#allocation17_spill] sm:$0xff] }
 0x3db   :  { %1517 = vmatpush.bf16.msra.mxu2 %v2725_v4  ;;  %1530 = vmatpush.bf16.msra.mxu3 %v2721_v2 }
 0x3de   :  { %1492 = vmatpush.bf16.msra.mxu0 %v2723_v3  ;;  %1505 = vmatpush.bf16.msra.mxu1 %v2734_v10 }
 0x3df   :  { %1518 = vmatpush.bf16.msra.mxu2 %v2743_v14  ;;  %1531 = vmatpush.bf16.msra.mxu3 %v2747_v15 }
 0x43d   :  { %v1244_v37 = vpop.f32.mrf.mxu0  ;;  %v1257_v41 = vpop.f32.mrf.mxu1 }
 0x43e   :  { %v1287_v48 = vadd.f32 %v1244_v37, %v3202_v47  ;;  %v1288_v53 = vadd.f32 %v1257_v41, %v3203_v49  ;;  %v3206_v37 = vld [vmem:[#allocation19_spill] sm:$0xff]  ;;  %v3207_v47 = vld [vmem:[#allocation20_spill] sm:$0xff] }
 0x440   :  { %v1983_v59 = vmul.f32 -1.442695, %v1287_v48  ;;  %v1984_v60 = vmul.f32 -1.442695, %v1288_v53 }
 0x442   :  { %2182 = vpow2.f32 %v1983_v59 }
 0x443   :  { %2184 = vpow2.f32 %v1984_v60 }
 0x444   :  { %v1270_v61 = vpop.f32.mrf.mxu2  ;;  %v1283_v1 = vpop.f32.mrf.mxu3 }
 0x445   :  { %v1290_v8 = vadd.f32 %v1283_v1, %v3204_v7  ;;  %v1246_v9 = vpop.f32.mrf.mxu0  ;;  %v1259_v13 = vpop.f32.mrf.mxu1  ;;  %v1289_v52 = vadd.f32 %v1270_v61, %v3205_v51  ;;  %v3208_v61 = vld [vmem:[#allocation22_spill] sm:$0xff] }
 0x447   :  { %v1985_v20 = vmul.f32 -1.442695, %v1290_v8 }
 0x448   :  { %v2183_v21 = vpop.eup %2182 }
 0x449   :  { %v2185_v22 = vpop.eup %2184  ;;  %v1294_v26 = vadd.f32 1.0, %v2183_v21  ;;  %2186 = vpow2.f32 %v1985_v20 }
 0x44a   :  { %v1313_v32 = vadd.f32 1.0, %v2185_v22 }
 0x44b   :  { %2188 = vrcp.f32 %v1294_v26  ;;  %v1306_v15 = vand.u32 2147483648, %v1294_v26  ;;  %v1304_v31 = vand.u32 2147483647, %v1294_v26  ;;  %vm1300_vm14 = vweird.f32 %v1294_v26 }
 0x44c   :  { %2190 = vrcp.f32 %v1313_v32  ;;  %v1272_v33 = vpop.f32.mrf.mxu2  ;;  %v1285_v34 = vpop.f32.mrf.mxu3  ;;  %v1325_v11 = vand.u32 2147483648, %v1313_v32  ;;  %v1323_v45 = vand.u32 2147483647, %v1313_v32  ;;  %vm1319_vm15 = vweird.f32 %v1313_v32 }
 0x44d   :  { %v1307_v36 = vor.u32 1.1754944e-38, %v1306_v15  ;;  %vm1305_vm2 = vcmp.eq.f32.partialorder %v1304_v31, 8.507059e+37 }
 0x44e   :  { %v1326_v24 = vor.u32 1.1754944e-38, %v1325_v11  ;;  %vm1324_vm3 = vcmp.eq.f32.partialorder %v1323_v45, 8.507059e+37 }
 0x44f   :  { %v2187_v35 = vpop.eup %2186 }
 0x450   :  { %v1333_v43 = vadd.f32 1.0, %v2187_v35 }
 0x451   :  { %v2189_v44 = vpop.eup %2188 }
 0x452   :  { %v2191_v2 = vpop.eup %2190  ;;  %v1296_v3 = vmul.f32 %v2189_v44, %v1294_v26  ;;  %2192 = vrcp.f32 %v1333_v43  ;;  %vm1301_vm12 = vweird.f32 %v2189_v44  ;;  %v1345_v56 = vand.u32 2147483648, %v1333_v43 }
 0x453   :  { %v1315_v4 = vmul.f32 %v2191_v2, %v1313_v32  ;;  %2194 = vtanh.f32 %v1289_v52  ;;  %vm1320_vm13 = vweird.f32 %v2191_v2  ;;  %vm1302_vm0 = vmor %vm1300_vm14, %vm1301_vm12  ;;  %vm1339_vm5 = vweird.f32 %v1333_v43 }
 0x454   :  { %v1297_v10 = vsub.f32 1.0, %v1296_v3  ;;  %vm1321_vm1 = vmor %vm1319_vm15, %vm1320_vm13  ;;  %v1343_v5 = vand.u32 2147483647, %v1333_v43  ;;  %v1346_v25 = vor.u32 1.1754944e-38, %v1345_v56 }
 0x455   :  { %v1316_v14 = vsub.f32 1.0, %v1315_v4 }
 0x456   :  { %v1298_v54 = vmul.f32 %v2189_v44, %v1297_v10  ;;  %vm1344_vm7 = vcmp.eq.f32.partialorder %v1343_v5, 8.507059e+37 }
 0x457   :  { %v1317_v23 = vmul.f32 %v2191_v2, %v1316_v14 }
 0x458   :  { %v2193_v62 = vpop.eup %2192  ;;  %v1299_v28 = vadd.f32 %v2189_v44, %v1298_v54 }
 0x459   :  { %v1318_v40 = vadd.f32 %v2191_v2, %v1317_v23  ;;  %v1335_v6 = vmul.f32 %v2193_v62, %v1333_v43  ;;  %v2195_v42 = vpop.eup %2194  ;;  %vm1340_vm4 = vweird.f32 %v2193_v62  ;;  %v3209_v43 = vld [vmem:[#allocation21_spill] sm:$0xff] }
 0x45a   :  { %v1303_v18 = vsel %vm1302_vm0, %v2189_v44, %v1299_v28  ;;  %vm1341_vm6 = vmor %vm1339_vm5, %vm1340_vm4 }
 0x45b   :  { %v1308_v30 = vsel %vm1305_vm2, %v1307_v36, %v1303_v18  ;;  %v1322_v39 = vsel %vm1321_vm1, %v2191_v2, %v1318_v40  ;;  %v1336_v12 = vsub.f32 1.0, %v1335_v6 }
 0x45c   :  { %v1327_v63 = vsel %vm1324_vm3, %v1326_v24, %v1322_v39  ;;  %v1350_v17 = vmul.f32 %v2195_v42, %v1308_v30 }
 0x45d   :  { %v1349_v46 = vmul.f32 %v1327_v63, %v3077_v19  ;;  %v1337_v29 = vmul.f32 %v2193_v62, %v1336_v12 }
 0x45f   :  { %v3117_v27 = vadd.f32 %v1350_v17, %v1349_v46  ;;  %v1338_v50 = vadd.f32 %v2193_v62, %v1337_v29 }
 0x461   :  { %2196 = vtanh.f32 %v3117_v27  ;;  %v1342_v55 = vsel %vm1341_vm6, %v2193_v62, %v1338_v50 }
 0x462   :  { %v1347_v57 = vsel %vm1344_vm7, %v1346_v25, %v1342_v55 }
 0x467   :  { %v2197_v58 = vpop.eup %2196 }
 0x468   :  { %v1353_v0 = vmul.f32 %v2197_v58, %v1347_v57 }
 0x46a   :  { %v1359_v16 = vpack.c.bf16 %v1353_v0, %v1353_v0 }
 0x46c   :  { %1368 = vmatmul.bf16.vlgmr.msrb.gmra.mxu0 %v1359_v16  ;;  %1381 = vmatmul.bf16.vlgmr.msrb.gmra.mxu1 %v1359_v16 }
 0x46d   :  { %1394 = vmatmul.bf16.vlgmr.msrb.gmra.mxu2 %v1359_v16  ;;  %1407 = vmatmul.bf16.vlgmr.msrb.gmra.mxu3 %v1359_v16  ;;  %v2098_v16 = vld [vmem:[%s3168_s4 + $0x30] sm:$0xff] }
 0x4e9   :  { %v1369_v19 = vpop.f32.mrf.mxu0  ;;  %v1382_v38 = vpop.f32.mrf.mxu1 }
 0x4ea   :  { %v1412_v41 = vadd.f32 %v1369_v19, %v3206_v37  ;;  %v1413_v48 = vadd.f32 %v1382_v38, %v3207_v47  ;;  %v2097_v19 = vld [vmem:[%s3168_s4 + $0x28] sm:$0xff]  ;;  %v2096_v38 = vld [vmem:[%s3168_s4 + $0x20] sm:$0xff]  ;;  %v2095_v37 = vld [vmem:[%s3168_s4 + $0x18] sm:$0xff] }
 0x4ec   :  { %v1986_v49 = vmul.f32 -1.442695, %v1412_v41  ;;  %v1987_v53 = vmul.f32 -1.442695, %v1413_v48  ;;  %v3210_v48 = vld [vmem:[#allocation23_spill] sm:$0xff] }
 0x4ee   :  { %2198 = vpow2.f32 %v1986_v49 }
 0x4ef   :  { %2200 = vpow2.f32 %v1987_v53  ;;  %v3211_v53 = vld [vmem:[#allocation24_spill] sm:$0xff] }
 0x4f0   :  { %v1395_v59 = vpop.f32.mrf.mxu2  ;;  %v1408_v60 = vpop.f32.mrf.mxu3 }
 0x4f1   :  { %v1415_v1 = vadd.f32 %v1408_v60, %v3208_v61  ;;  %v1371_v7 = vpop.f32.mrf.mxu0  ;;  %v1384_v8 = vpop.f32.mrf.mxu1  ;;  %v1414_v44 = vadd.f32 %v1395_v59, %v3209_v43 }
 0x4f2   :  { %v2093_v7 = vld [vmem:[%s3168_s4 + $0x8] sm:$0xff] }
 0x4f3   :  { %v1988_v9 = vmul.f32 -1.442695, %v1415_v1  ;;  %v2094_v1 = vld [vmem:[%s3168_s4 + $0x10] sm:$0xff] }
 0x4f4   :  { %v2199_v13 = vpop.eup %2198 }
 0x4f5   :  { %v2201_v20 = vpop.eup %2200  ;;  %v1419_v21 = vadd.f32 1.0, %v2199_v13  ;;  %2202 = vpow2.f32 %v1988_v9  ;;  %v3212_v13 = vld [vmem:[#allocation26_spill] sm:$0xff] }
 0x4f6   :  { %v1438_v22 = vadd.f32 1.0, %v2201_v20 }
 0x4f7   :  { %2204 = vrcp.f32 %v1419_v21  ;;  %v1431_v10 = vand.u32 2147483648, %v1419_v21  ;;  %v1429_v11 = vand.u32 2147483647, %v1419_v21  ;;  %vm1425_vm10 = vweird.f32 %v1419_v21 }
 0x4f8   :  { %2206 = vrcp.f32 %v1438_v22  ;;  %v1397_v26 = vpop.f32.mrf.mxu2  ;;  %v1410_v32 = vpop.f32.mrf.mxu3  ;;  %v1450_v14 = vand.u32 2147483648, %v1438_v22  ;;  %v1448_v31 = vand.u32 2147483647, %v1438_v22  ;;  %vm1444_vm11 = vweird.f32 %v1438_v22 }
 0x4f9   :  { %v1432_v62 = vor.u32 1.1754944e-38, %v1431_v10  ;;  %vm1430_vm14 = vcmp.eq.f32.partialorder %v1429_v11, 8.507059e+37  ;;  %v2092_v26 = vld [vmem:[%s3168_s4] sm:$0xff] }
 0x4fa   :  { %v1451_v40 = vor.u32 1.1754944e-38, %v1450_v14  ;;  %vm1449_vm15 = vcmp.eq.f32.partialorder %v1448_v31, 8.507059e+37 }
 0x4fb   :  { %v2203_v33 = vpop.eup %2202 }
 0x4fc   :  { %v1458_v34 = vadd.f32 1.0, %v2203_v33 }
 0x4fd   :  { %v2205_v35 = vpop.eup %2204 }
 0x4fe   :  { %v2207_v51 = vpop.eup %2206  ;;  %v1421_v52 = vmul.f32 %v2205_v35, %v1419_v21  ;;  %2208 = vrcp.f32 %v1458_v34  ;;  %vm1426_vm8 = vweird.f32 %v2205_v35  ;;  %v1470_v50 = vand.u32 2147483648, %v1458_v34 }
 0x4ff   :  { %v1440_v2 = vmul.f32 %v2207_v51, %v1438_v22  ;;  %2210 = vtanh.f32 %v1414_v44  ;;  %vm1445_vm9 = vweird.f32 %v2207_v51  ;;  %vm1427_vm12 = vmor %vm1425_vm10, %vm1426_vm8  ;;  %vm1464_vm1 = vweird.f32 %v1458_v34 }
 0x500   :  { %v1422_v3 = vsub.f32 1.0, %v1421_v52  ;;  %vm1446_vm13 = vmor %vm1444_vm11, %vm1445_vm9  ;;  %v1468_v56 = vand.u32 2147483647, %v1458_v34  ;;  %v1471_v55 = vor.u32 1.1754944e-38, %v1470_v50 }
 0x501   :  { %v1441_v4 = vsub.f32 1.0, %v1440_v2 }
 0x502   :  { %v1423_v15 = vmul.f32 %v2205_v35, %v1422_v3  ;;  %vm1469_vm3 = vcmp.eq.f32.partialorder %v1468_v56, 8.507059e+37 }
 0x503   :  { %v1442_v54 = vmul.f32 %v2207_v51, %v1441_v4  ;;  %v3213_v4 = vld [vmem:[#allocation25_spill] sm:$0xff] }
 0x504   :  { %v2209_v23 = vpop.eup %2208  ;;  %v1424_v45 = vadd.f32 %v2205_v35, %v1423_v15 }
 0x505   :  { %v1443_v28 = vadd.f32 %v2207_v51, %v1442_v54  ;;  %v1460_v36 = vmul.f32 %v2209_v23, %v1458_v34  ;;  %v2211_v24 = vpop.eup %2210  ;;  %vm1465_vm0 = vweird.f32 %v2209_v23 }
 0x506   :  { %v1428_v6 = vsel %vm1427_vm12, %v2205_v35, %v1424_v45  ;;  %vm1466_vm2 = vmor %vm1464_vm1, %vm1465_vm0 }
 0x507   :  { %v1433_v18 = vsel %vm1430_vm14, %v1432_v62, %v1428_v6  ;;  %v1447_v42 = vsel %vm1446_vm13, %v2207_v51, %v1443_v28  ;;  %v1461_v30 = vsub.f32 1.0, %v1460_v36 }
 0x508   :  { %v1452_v39 = vsel %vm1449_vm15, %v1451_v40, %v1447_v42  ;;  %v1475_v12 = vmul.f32 %v2211_v24, %v1433_v18 }
 0x509   :  { %v1474_v63 = vmul.f32 %v1452_v39, %v3117_v27  ;;  %v1462_v17 = vmul.f32 %v2209_v23, %v1461_v30  ;;  %v2099_v27 = vld [vmem:[%s3168_s4 + $0x38] sm:$0xff] }
 0x50a   :  { %1678 = vmatpush.bf16.msrb.mxu0 %v2099_v27 }
 0x50b   :  { %v3125_v46 = vadd.f32 %v1475_v12, %v1474_v63  ;;  %v1463_v29 = vadd.f32 %v2209_v23, %v1462_v17 }
 0x50d   :  { %2212 = vtanh.f32 %v3125_v46  ;;  %v1467_v5 = vsel %vm1466_vm2, %v2209_v23, %v1463_v29 }
 0x50e   :  { %v1472_v58 = vsel %vm1469_vm3, %v1471_v55, %v1467_v5  ;;  %1679 = vmatpush.bf16.msrb.mxu0 %v2098_v16 }
 0x512   :  { %1680 = vmatpush.bf16.msrb.mxu0 %v2097_v19 }
 0x513   :  { %v2213_v25 = vpop.eup %2212 }
 0x514   :  { %v1478_v57 = vmul.f32 %v2213_v25, %v1472_v58 }
 0x516   :  { %v1484_v0 = vpack.c.bf16 %v1478_v57, %v1478_v57  ;;  %1681 = vmatpush.bf16.msrb.mxu0 %v2096_v38 }
 0x518   :  { %1493 = vmatmul.bf16.vlgmr.msra.gmra.mxu0 %v1484_v0  ;;  %1506 = vmatmul.bf16.vlgmr.msra.gmra.mxu1 %v1484_v0 }
 0x519   :  { %1519 = vmatmul.bf16.vlgmr.msra.gmra.mxu2 %v1484_v0  ;;  %1532 = vmatmul.bf16.vlgmr.msra.gmra.mxu3 %v1484_v0 }
 0x51a   :  { %1682 = vmatpush.bf16.msrb.mxu0 %v2095_v37 }
 0x51e   :  { %1683 = vmatpush.bf16.msrb.mxu0 %v2094_v1 }
 0x522   :  { %1684 = vmatpush.bf16.msrb.mxu0 %v2093_v7 }
 0x526   :  { %1685 = vmatpush.bf16.msrb.mxu0 %v2092_v26 }
 0x595   :  { %v1494_v41 = vpop.f32.mrf.mxu0  ;;  %v1507_v47 = vpop.f32.mrf.mxu1 }
 0x596   :  { %v1537_v49 = vadd.f32 %v1494_v41, %v3210_v48  ;;  %v1538_v59 = vadd.f32 %v1507_v47, %v3211_v53 }
 0x598   :  { %v1989_v60 = vmul.f32 -1.442695, %v1537_v49  ;;  %v1990_v61 = vmul.f32 -1.442695, %v1538_v59 }
 0x59a   :  { %2214 = vpow2.f32 %v1989_v60 }
 0x59b   :  { %2216 = vpow2.f32 %v1990_v61 }
 0x59c   :  { %v1520_v8 = vpop.f32.mrf.mxu2  ;;  %v1533_v9 = vpop.f32.mrf.mxu3 }
 0x59d   :  { %v1540_v20 = vadd.f32 %v1533_v9, %v3212_v13  ;;  %v1496_v21 = vpop.f32.mrf.mxu0  ;;  %v1509_v22 = vpop.f32.mrf.mxu1  ;;  %v1539_v10 = vadd.f32 %v1520_v8, %v3213_v4 }
 0x59f   :  { %v1991_v32 = vmul.f32 -1.442695, %v1540_v20 }
 0x5a0   :  { %v2215_v33 = vpop.eup %2214 }
 0x5a1   :  { %v2217_v34 = vpop.eup %2216  ;;  %v1544_v35 = vadd.f32 1.0, %v2215_v33  ;;  %2218 = vpow2.f32 %v1991_v32 }
 0x5a2   :  { %v1563_v43 = vadd.f32 1.0, %v2217_v34 }
 0x5a3   :  { %2220 = vrcp.f32 %v1544_v35  ;;  %v1556_v23 = vand.u32 2147483648, %v1544_v35  ;;  %v1554_v28 = vand.u32 2147483647, %v1544_v35  ;;  %vm1550_vm6 = vweird.f32 %v1544_v35 }
 0x5a4   :  { %2222 = vrcp.f32 %v1563_v43  ;;  %v1522_v44 = vpop.f32.mrf.mxu2  ;;  %v1535_v51 = vpop.f32.mrf.mxu3  ;;  %v1575_v45 = vand.u32 2147483648, %v1563_v43  ;;  %v1573_v40 = vand.u32 2147483647, %v1563_v43  ;;  %vm1569_vm7 = vweird.f32 %v1563_v43 }
 0x5a5   :  { %v1557_v18 = vor.u32 1.1754944e-38, %v1556_v23  ;;  %vm1555_vm10 = vcmp.eq.f32.partialorder %v1554_v28, 8.507059e+37 }
 0x5a6   :  { %v1576_v39 = vor.u32 1.1754944e-38, %v1575_v45  ;;  %vm1574_vm11 = vcmp.eq.f32.partialorder %v1573_v40, 8.507059e+37 }
 0x5a7   :  { %v2219_v52 = vpop.eup %2218 }
 0x5a8   :  { %v1583_v2 = vadd.f32 1.0, %v2219_v52 }
 0x5a9   :  { %v2221_v3 = vpop.eup %2220 }
 0x5aa   :  { %v2223_v14 = vpop.eup %2222  ;;  %v1546_v15 = vmul.f32 %v2221_v3, %v1544_v35  ;;  %2224 = vrcp.f32 %v1583_v2  ;;  %vm1551_vm4 = vweird.f32 %v2221_v3  ;;  %v1595_v0 = vand.u32 2147483648, %v1583_v2 }
 0x5ab   :  { %v1565_v11 = vmul.f32 %v2223_v14, %v1563_v43  ;;  %2226 = vtanh.f32 %v1539_v10  ;;  %vm1570_vm5 = vweird.f32 %v2223_v14  ;;  %vm1552_vm8 = vmor %vm1550_vm6, %vm1551_vm4  ;;  %vm1589_vm13 = vweird.f32 %v1583_v2 }
 0x5ac   :  { %v1547_v54 = vsub.f32 1.0, %v1546_v15  ;;  %vm1571_vm9 = vmor %vm1569_vm7, %vm1570_vm5  ;;  %v1593_v27 = vand.u32 2147483647, %v1583_v2  ;;  %v1596_v19 = vor.u32 1.1754944e-38, %v1595_v0 }
 0x5ad   :  { %v1566_v31 = vsub.f32 1.0, %v1565_v11 }
 0x5ae   :  { %v1548_v62 = vmul.f32 %v2221_v3, %v1547_v54  ;;  %vm1594_vm15 = vcmp.eq.f32.partialorder %v1593_v27, 8.507059e+37 }
 0x5af   :  { %v1567_v36 = vmul.f32 %v2223_v14, %v1566_v31 }
 0x5b0   :  { %v2225_v6 = vpop.eup %2224  ;;  %v1549_v24 = vadd.f32 %v2221_v3, %v1548_v62 }
 0x5b1   :  { %v1568_v42 = vadd.f32 %v2223_v14, %v1567_v36  ;;  %v1585_v30 = vmul.f32 %v2225_v6, %v1583_v2  ;;  %v2227_v63 = vpop.eup %2226  ;;  %vm1590_vm12 = vweird.f32 %v2225_v6 }
 0x5b2   :  { %v1553_v12 = vsel %vm1552_vm8, %v2221_v3, %v1549_v24  ;;  %vm1591_vm14 = vmor %vm1589_vm13, %vm1590_vm12 }
 0x5b3   :  { %v1558_v17 = vsel %vm1555_vm10, %v1557_v18, %v1553_v12  ;;  %v1572_v29 = vsel %vm1571_vm9, %v2223_v14, %v1568_v42  ;;  %v1586_v50 = vsub.f32 1.0, %v1585_v30 }
 0x5b4   :  { %v1577_v56 = vsel %vm1574_vm11, %v1576_v39, %v1572_v29  ;;  %v1600_v5 = vmul.f32 %v2227_v63, %v1558_v17 }
 0x5b5   :  { %v1599_v55 = vmul.f32 %v1577_v56, %v3125_v46  ;;  %v1587_v25 = vmul.f32 %v2225_v6, %v1586_v50  ;;  %v2101_v46 = vld [vmem:[%s3167_s5] ss:$0 sm:$0xff] }
 0x5b7   :  { %v1601_v58 = vadd.f32 %v1600_v5, %v1599_v55  ;;  %v1588_v57 = vadd.f32 %v2225_v6, %v1587_v25 }
 0x5b9   :  { %2228 = vtanh.f32 %v1601_v58  ;;  %v1592_v16 = vsel %vm1591_vm14, %v2225_v6, %v1588_v57 }
 0x5ba   :  { %v1597_v37 = vsel %vm1594_vm15, %v1596_v19, %v1592_v16 }
 0x5bf   :  { %v2229_v38 = vpop.eup %2228 }
 0x5c0   :  { %v1603_v41 = vmul.f32 %v2229_v38, %v1597_v37 }
 0x5c2   :  { %v1609_v47 = vpack.c.bf16 %v1603_v41, %v1603_v41 }
 0x5c4   :  { %1686 = vmatmul.bf16.vlgmr.msrb.gmra.mxu0 %v1609_v47 }
 0x641   :  { %v1687_v48 = vpop.f32.mrf.mxu0 }
 0x642   :  { %v1688_v49 = vadd.f32 %v2101_v46, %v1687_v48 }
 0x644   :  { %1691 = vst [vmem:[%s3169_s6] sm:$0xff] %v1688_v49 }
 0x649   :  { %v1689_v53 = vpop.f32.mrf.mxu0 }

</bundles_post_ra>
